<compile_context>
chip_gen: v7x
topology: tpu7x:2x2x1
jax: 0.10.0
libtpu: 0.0.40
codegen_flags: <defaults>
</compile_context>

<pallas_src>
import jax
import jax.numpy as jnp
from jax.experimental import pallas as pl
from jax.experimental.pallas import tpu as pltpu

# ----------------------------- model config ---------------------------------
B = 2          # batch
S = 8          # sequence length
H = 32         # hidden size
NH = 2         # attention heads
DH = H // NH   # head dim
F = 64         # FFN intermediate size
V = 100        # vocab size
NLAYERS = 2    # encoder layers
LN_EPS = 1e-12
BS = B * S


def _layernorm(x, g, b):
    mu = jnp.mean(x, axis=-1, keepdims=True)
    var = jnp.mean((x - mu) ** 2, axis=-1, keepdims=True)
    return (x - mu) * jax.lax.rsqrt(var + LN_EPS) * g + b


# --------------------------- fused Pallas kernel ------------------------------
def fused_molformer_kernel(ids_ref, mask_ref,
                           tok_emb_ref, pos_emb_ref, emb_ln_g_ref, emb_ln_b_ref,
                           wqkv_ref, bqkv_ref, wo_ref, bo_ref,
                           ln1g_ref, ln1b_ref, w1_ref, b1_ref, w2_ref, b2_ref,
                           ln2g_ref, ln2b_ref,
                           wp_ref, bp_ref, wr_ref, br_ref,
                           o_ref):
    # ---- embedding lookup as a one-hot MXU matmul (no XLA gather) ----
    ids = ids_ref[...]                                            # (BS, 1) int32
    vocab_iota = jax.lax.broadcasted_iota(jnp.int32, (BS, V), 1)  # (BS, V)
    onehot = (ids == vocab_iota).astype(jnp.bfloat16)             # (BS, V)
    tok = jnp.dot(onehot, tok_emb_ref[...],
                  preferred_element_type=jnp.float32)             # (BS, H) f32
    pos = pos_emb_ref[...]                                        # (S, H)
    pos_full = jnp.concatenate([pos] * B, axis=0)                 # (BS, H)
    x = tok + pos_full

    # embedding LayerNorm (f32)
    x = _layernorm(x, emb_ln_g_ref[...], emb_ln_b_ref[...])

    # ---- additive attention bias: block-diagonal over batch + key padding ----
    row_pos = jax.lax.broadcasted_iota(jnp.int32, (BS, BS), 0)
    col_pos = jax.lax.broadcasted_iota(jnp.int32, (BS, BS), 1)
    same_batch = None
    for b in range(B):                       # static; avoids vector int division
        in_row = (row_pos >= b * S) & (row_pos < (b + 1) * S)
        in_col = (col_pos >= b * S) & (col_pos < (b + 1) * S)
        both = in_row & in_col
        same_batch = both if same_batch is None else (same_batch | both)
    keep_cols = mask_ref[...] > 0.5                               # (1, BS) bool
    allowed = same_batch & keep_cols                              # (BS, BS) bool
    bias = jnp.where(allowed, jnp.float32(0.0), jnp.float32(-1e9))

    # ---- encoder layers (statically unrolled) ----
    for l in range(NLAYERS):
        wo_l = wo_ref[l]                                          # (H, H) bf16

        # fused QKV projection (scale already folded into Q columns of wqkv)
        qkv = jnp.dot(x.astype(jnp.bfloat16), wqkv_ref[l],
                      preferred_element_type=jnp.float32) + bqkv_ref[l]  # (BS, 3H)
        q = qkv[:, 0:H]
        k = qkv[:, H:2 * H]
        v = qkv[:, 2 * H:3 * H]

        attn = None
        for h in range(NH):                                       # static head loop
            sl = slice(h * DH, (h + 1) * DH)
            qh = q[:, sl].astype(jnp.bfloat16)                    # (BS, DH)
            kh = k[:, sl].astype(jnp.bfloat16)
            vh = v[:, sl].astype(jnp.bfloat16)

            # contract last dims directly (no explicit kh.T / XLU transpose)
            s = jax.lax.dot_general(qh, kh, (((1,), (1,)), ((), ())),
                                    preferred_element_type=jnp.float32)  # (BS, BS)
            s = s + bias
            s = s - jnp.max(s, axis=-1, keepdims=True)
            p = jnp.exp(s)
            p = p * pl.reciprocal(jnp.sum(p, axis=-1, keepdims=True), approx=True)

            ctx_h = jnp.dot(p.astype(jnp.bfloat16), vh,
                            preferred_element_type=jnp.float32)   # (BS, DH)
            # fold head context straight into the output projection rows of Wo:
            # avoids a lane-axis concat of per-head contexts.
            part = jnp.dot(ctx_h.astype(jnp.bfloat16), wo_l[sl, :],
                           preferred_element_type=jnp.float32)    # (BS, H)
            attn = part if attn is None else attn + part
        attn = attn + bo_ref[l]

        # residual + LayerNorm 1
        h1 = _layernorm(x + attn, ln1g_ref[l], ln1b_ref[l])

        # FFN
        f = jnp.dot(h1.astype(jnp.bfloat16), w1_ref[l],
                    preferred_element_type=jnp.float32) + b1_ref[l]
        # TODO(synk): PyTorch nn.GELU defaults to the exact erf form; the tanh
        # approximation is used here (erf lowering on Mosaic unverified), ~1e-3 diff.
        f = jax.nn.gelu(f)
        f = jnp.dot(f.astype(jnp.bfloat16), w2_ref[l],
                    preferred_element_type=jnp.float32) + b2_ref[l]

        # residual + LayerNorm 2
        x = _layernorm(h1 + f, ln2g_ref[l], ln2b_ref[l])

    # ---- pooler (tanh(W_p h_cls + b_p)) + Linear(H, 1) regressor ----
    cls = jnp.concatenate([x[b * S:b * S + 1, :] for b in range(B)], axis=0)  # (B, H)
    pooled = jnp.tanh(jnp.dot(cls.astype(jnp.bfloat16), wp_ref[...],
                              preferred_element_type=jnp.float32) + bp_ref[...])
    # H -> 1 projection as VPU multiply + lane reduction (no width-1 MXU matmul)
    logits = jnp.sum(pooled * wr_ref[...], axis=-1, keepdims=True) + br_ref[...]
    o_ref[...] = logits.astype(jnp.float32)


# ------------------------- parameter construction ----------------------------
def init_params(key):
    def nrm(k, shape, scale=0.02):
        return scale * jax.random.normal(k, shape, dtype=jnp.float32)

    keys = iter(jax.random.split(key, 16))
    attn_scale = 1.0 / float(DH) ** 0.5

    wqkv = nrm(next(keys), (NLAYERS, H, 3 * H))
    # Fold the 1/sqrt(DH) attention scale into the Q projection columns
    # (the Q bias is zero, so it needs no scaling).
    wqkv = wqkv.at[:, :, :H].multiply(attn_scale)

    params = {
        "tok_emb": nrm(next(keys), (V, H)).astype(jnp.bfloat16),
        "pos_emb": nrm(next(keys), (S, H)),
        "emb_ln_g": jnp.ones((1, H), jnp.float32),
        "emb_ln_b": jnp.zeros((1, H), jnp.float32),
        # per-layer weights stacked along a leading NLAYERS axis
        "wqkv": wqkv.astype(jnp.bfloat16),
        "bqkv": jnp.zeros((NLAYERS, 1, 3 * H), jnp.float32),
        "wo": nrm(next(keys), (NLAYERS, H, H)).astype(jnp.bfloat16),
        "bo": jnp.zeros((NLAYERS, 1, H), jnp.float32),
        "ln1_g": jnp.ones((NLAYERS, 1, H), jnp.float32),
        "ln1_b": jnp.zeros((NLAYERS, 1, H), jnp.float32),
        "w1": nrm(next(keys), (NLAYERS, H, F)).astype(jnp.bfloat16),
        "b1": jnp.zeros((NLAYERS, 1, F), jnp.float32),
        "w2": nrm(next(keys), (NLAYERS, F, H)).astype(jnp.bfloat16),
        "b2": jnp.zeros((NLAYERS, 1, H), jnp.float32),
        "ln2_g": jnp.ones((NLAYERS, 1, H), jnp.float32),
        "ln2_b": jnp.zeros((NLAYERS, 1, H), jnp.float32),
        "pooler_w": nrm(next(keys), (H, H)).astype(jnp.bfloat16),
        "pooler_b": jnp.zeros((1, H), jnp.float32),
        # nn.Linear(H, 1) weight in PyTorch (out, in) layout -> (1, H)
        "reg_w": nrm(next(keys), (1, H)),
        "reg_b": jnp.zeros((1, 1), jnp.float32),
    }
    return params


# ------------------------------ forward --------------------------------------
@jax.jit
def molformer_regressor_forward(input_ids, attention_mask, params):
    ids_col = input_ids.reshape(BS, 1).astype(jnp.int32)                 # (B*S, 1)
    mask_row = attention_mask.astype(jnp.float32).reshape(1, BS)         # (1, B*S)
    return pl.pallas_call(
        fused_molformer_kernel,
        out_shape=jax.ShapeDtypeStruct((B, 1), jnp.float32),
        compiler_params=pltpu.CompilerParams(vmem_limit_bytes=8 * 1024 * 1024),
    )(ids_col, mask_row,
      params["tok_emb"], params["pos_emb"], params["emb_ln_g"], params["emb_ln_b"],
      params["wqkv"], params["bqkv"], params["wo"], params["bo"],
      params["ln1_g"], params["ln1_b"], params["w1"], params["b1"],
      params["w2"], params["b2"], params["ln2_g"], params["ln2_b"],
      params["pooler_w"], params["pooler_b"], params["reg_w"], params["reg_b"])


# -------------------------------- main ----------------------------------------
if __name__ == "__main__":
    key = jax.random.PRNGKey(0)
    k_ids, k_params = jax.random.split(key)

    input_ids = jax.random.randint(k_ids, (B, S), 0, V, dtype=jnp.int32)
    attention_mask = jnp.array(
        [[1, 1, 1, 1, 1, 1, 1, 1],
         [1, 1, 1, 1, 1, 1, 0, 0]], dtype=jnp.int32)

    params = init_params(k_params)

    out = molformer_regressor_forward(input_ids, attention_mask, params)
    out = jax.block_until_ready(out)
    assert out.shape == (B, 1) and out.dtype == jnp.float32
    assert bool(jnp.all(jnp.isfinite(out)))
    print("KERNEL_OK")
</pallas_src>

<mosaic_0001>
module attributes {stable_mosaic.version = 11 : i64} {
  func.func @fused_molformer_kernel(%arg0: memref<16x1xi32, #tpu.memory_space<vmem>>, %arg1: memref<1x16xf32, #tpu.memory_space<vmem>>, %arg2: memref<100x32xbf16, #tpu.memory_space<vmem>>, %arg3: memref<8x32xf32, #tpu.memory_space<vmem>>, %arg4: memref<1x32xf32, #tpu.memory_space<vmem>>, %arg5: memref<1x32xf32, #tpu.memory_space<vmem>>, %arg6: memref<2x32x96xbf16, #tpu.memory_space<vmem>>, %arg7: memref<2x1x96xf32, #tpu.memory_space<vmem>>, %arg8: memref<2x32x32xbf16, #tpu.memory_space<vmem>>, %arg9: memref<2x1x32xf32, #tpu.memory_space<vmem>>, %arg10: memref<2x1x32xf32, #tpu.memory_space<vmem>>, %arg11: memref<2x1x32xf32, #tpu.memory_space<vmem>>, %arg12: memref<2x32x64xbf16, #tpu.memory_space<vmem>>, %arg13: memref<2x1x64xf32, #tpu.memory_space<vmem>>, %arg14: memref<2x64x32xbf16, #tpu.memory_space<vmem>>, %arg15: memref<2x1x32xf32, #tpu.memory_space<vmem>>, %arg16: memref<2x1x32xf32, #tpu.memory_space<vmem>>, %arg17: memref<2x1x32xf32, #tpu.memory_space<vmem>>, %arg18: memref<32x32xbf16, #tpu.memory_space<vmem>>, %arg19: memref<1x32xf32, #tpu.memory_space<vmem>>, %arg20: memref<1x32xf32, #tpu.memory_space<vmem>>, %arg21: memref<1x1xf32, #tpu.memory_space<vmem>>, %arg22: memref<2x1xf32, #tpu.memory_space<vmem>>) attributes {dimension_semantics = [], scalar_prefetch = 0 : i64, scratch_operands = 0 : i64, tpu.core_type = #tpu.core_type<tc>} {
    %c0 = arith.constant 0 : index
    %c0_0 = arith.constant 0 : index
    %0 = vector.load %arg0[%c0, %c0_0] : memref<16x1xi32, #tpu.memory_space<vmem>>, vector<16x1xi32>
    %1 = tpu.iota {dimensions = array<i32: 1>} : vector<16x100xi32>
    %2 = vector.broadcast %0 : vector<16x1xi32> to vector<16x100xi32>
    %3 = arith.cmpi eq, %2, %1 : vector<16x100xi32>
    %4 = arith.extui %3 : vector<16x100xi1> to vector<16x100xi32>
    %5 = arith.sitofp %4 : vector<16x100xi32> to vector<16x100xf32>
    %6 = arith.truncf %5 : vector<16x100xf32> to vector<16x100xbf16>
    %c0_1 = arith.constant 0 : index
    %c0_2 = arith.constant 0 : index
    %7 = vector.load %arg2[%c0_1, %c0_2] : memref<100x32xbf16, #tpu.memory_space<vmem>>, vector<100x32xbf16>
    %cst = arith.constant dense<0.000000e+00> : vector<16x32xf32>
    %8 = tpu.matmul %6, %7, %cst {dimension_numbers = #tpu.dot_dimension_numbers<[1], [0], [0], [1], [0, 0, 1, 1], [], []>} : vector<16x100xbf16>, vector<100x32xbf16>, vector<16x32xf32> -> vector<16x32xf32>
    %c0_3 = arith.constant 0 : index
    %c0_4 = arith.constant 0 : index
    %9 = vector.load %arg3[%c0_3, %c0_4] : memref<8x32xf32, #tpu.memory_space<vmem>>, vector<8x32xf32>
    %10 = tpu.concatenate %9, %9 in 0 : vector<8x32xf32>, vector<8x32xf32> -> vector<16x32xf32>
    %11 = arith.addf %8, %10 : vector<16x32xf32>
    %c0_5 = arith.constant 0 : index
    %c0_6 = arith.constant 0 : index
    %12 = vector.load %arg4[%c0_5, %c0_6] : memref<1x32xf32, #tpu.memory_space<vmem>>, vector<1x32xf32>
    %c0_7 = arith.constant 0 : index
    %c0_8 = arith.constant 0 : index
    %13 = vector.load %arg5[%c0_7, %c0_8] : memref<1x32xf32, #tpu.memory_space<vmem>>, vector<1x32xf32>
    %cst_9 = arith.constant dense<0.000000e+00> : vector<16xf32>
    %14 = vector.multi_reduction <add>, %11, %cst_9 [1] : vector<16x32xf32> to vector<16xf32>
    %15 = vector.shape_cast %14 : vector<16xf32> to vector<16x1xf32>
    %cst_10 = arith.constant 3.200000e+01 : f32
    %16 = vector.broadcast %cst_10 : f32 to vector<16x1xf32>
    %17 = arith.divf %15, %16 : vector<16x1xf32>
    %18 = vector.broadcast %17 : vector<16x1xf32> to vector<16x32xf32>
    %19 = arith.subf %11, %18 : vector<16x32xf32>
    %20 = arith.mulf %19, %19 : vector<16x32xf32>
    %cst_11 = arith.constant dense<0.000000e+00> : vector<16xf32>
    %21 = vector.multi_reduction <add>, %20, %cst_11 [1] : vector<16x32xf32> to vector<16xf32>
    %22 = vector.shape_cast %21 : vector<16xf32> to vector<16x1xf32>
    %cst_12 = arith.constant 3.200000e+01 : f32
    %23 = vector.broadcast %cst_12 : f32 to vector<16x1xf32>
    %24 = arith.divf %22, %23 : vector<16x1xf32>
    %25 = vector.broadcast %17 : vector<16x1xf32> to vector<16x32xf32>
    %26 = arith.subf %11, %25 : vector<16x32xf32>
    %cst_13 = arith.constant 9.99999996E-13 : f32
    %27 = vector.broadcast %cst_13 : f32 to vector<16x1xf32>
    %28 = arith.addf %24, %27 : vector<16x1xf32>
    %29 = math.rsqrt %28 : vector<16x1xf32>
    %30 = vector.broadcast %29 : vector<16x1xf32> to vector<16x32xf32>
    %31 = arith.mulf %26, %30 : vector<16x32xf32>
    %32 = vector.broadcast %12 : vector<1x32xf32> to vector<16x32xf32>
    %33 = arith.mulf %31, %32 : vector<16x32xf32>
    %34 = vector.broadcast %13 : vector<1x32xf32> to vector<16x32xf32>
    %35 = arith.addf %33, %34 : vector<16x32xf32>
    %36 = tpu.iota {dimensions = array<i32: 0>} : vector<16x16xi32>
    %37 = tpu.iota {dimensions = array<i32: 1>} : vector<16x16xi32>
    %c0_i32 = arith.constant 0 : i32
    %38 = vector.broadcast %c0_i32 : i32 to vector<16x16xi32>
    %39 = arith.cmpi sge, %36, %38 : vector<16x16xi32>
    %c8_i32 = arith.constant 8 : i32
    %40 = vector.broadcast %c8_i32 : i32 to vector<16x16xi32>
    %41 = arith.cmpi slt, %36, %40 : vector<16x16xi32>
    %42 = arith.andi %39, %41 : vector<16x16xi1>
    %c0_i32_14 = arith.constant 0 : i32
    %43 = vector.broadcast %c0_i32_14 : i32 to vector<16x16xi32>
    %44 = arith.cmpi sge, %37, %43 : vector<16x16xi32>
    %c8_i32_15 = arith.constant 8 : i32
    %45 = vector.broadcast %c8_i32_15 : i32 to vector<16x16xi32>
    %46 = arith.cmpi slt, %37, %45 : vector<16x16xi32>
    %47 = arith.andi %44, %46 : vector<16x16xi1>
    %48 = arith.andi %42, %47 : vector<16x16xi1>
    %c8_i32_16 = arith.constant 8 : i32
    %49 = vector.broadcast %c8_i32_16 : i32 to vector<16x16xi32>
    %50 = arith.cmpi sge, %36, %49 : vector<16x16xi32>
    %c16_i32 = arith.constant 16 : i32
    %51 = vector.broadcast %c16_i32 : i32 to vector<16x16xi32>
    %52 = arith.cmpi slt, %36, %51 : vector<16x16xi32>
    %53 = arith.andi %50, %52 : vector<16x16xi1>
    %c8_i32_17 = arith.constant 8 : i32
    %54 = vector.broadcast %c8_i32_17 : i32 to vector<16x16xi32>
    %55 = arith.cmpi sge, %37, %54 : vector<16x16xi32>
    %c16_i32_18 = arith.constant 16 : i32
    %56 = vector.broadcast %c16_i32_18 : i32 to vector<16x16xi32>
    %57 = arith.cmpi slt, %37, %56 : vector<16x16xi32>
    %58 = arith.andi %55, %57 : vector<16x16xi1>
    %59 = arith.andi %53, %58 : vector<16x16xi1>
    %60 = arith.ori %48, %59 : vector<16x16xi1>
    %c0_19 = arith.constant 0 : index
    %c0_20 = arith.constant 0 : index
    %61 = vector.load %arg1[%c0_19, %c0_20] : memref<1x16xf32, #tpu.memory_space<vmem>>, vector<1x16xf32>
    %cst_21 = arith.constant 5.000000e-01 : f32
    %62 = vector.broadcast %cst_21 : f32 to vector<1x16xf32>
    %63 = arith.cmpf ogt, %61, %62 : vector<1x16xf32>
    %64 = vector.broadcast %63 : vector<1x16xi1> to vector<16x16xi1>
    %65 = arith.andi %60, %64 : vector<16x16xi1>
    %cst_22 = arith.constant 0.000000e+00 : f32
    %cst_23 = arith.constant -1.000000e+09 : f32
    %66 = vector.broadcast %cst_22 : f32 to vector<16x16xf32>
    %67 = vector.broadcast %cst_23 : f32 to vector<16x16xf32>
    %68 = arith.select %65, %66, %67 : vector<16x16xi1>, vector<16x16xf32>
    %c0_24 = arith.constant 0 : index
    %c0_25 = arith.constant 0 : index
    %c0_26 = arith.constant 0 : index
    %69 = vector.load %arg8[%c0_24, %c0_25, %c0_26] : memref<2x32x32xbf16, #tpu.memory_space<vmem>>, vector<1x32x32xbf16>
    %70 = vector.shape_cast %69 : vector<1x32x32xbf16> to vector<32x32xbf16>
    %71 = arith.truncf %35 : vector<16x32xf32> to vector<16x32xbf16>
    %c0_27 = arith.constant 0 : index
    %c0_28 = arith.constant 0 : index
    %c0_29 = arith.constant 0 : index
    %72 = vector.load %arg6[%c0_27, %c0_28, %c0_29] : memref<2x32x96xbf16, #tpu.memory_space<vmem>>, vector<1x32x96xbf16>
    %73 = vector.shape_cast %72 : vector<1x32x96xbf16> to vector<32x96xbf16>
    %cst_30 = arith.constant dense<0.000000e+00> : vector<16x96xf32>
    %74 = tpu.matmul %71, %73, %cst_30 {dimension_numbers = #tpu.dot_dimension_numbers<[1], [0], [0], [1], [0, 0, 1, 1], [], []>} : vector<16x32xbf16>, vector<32x96xbf16>, vector<16x96xf32> -> vector<16x96xf32>
    %c0_31 = arith.constant 0 : index
    %c0_32 = arith.constant 0 : index
    %c0_33 = arith.constant 0 : index
    %75 = vector.load %arg7[%c0_31, %c0_32, %c0_33] : memref<2x1x96xf32, #tpu.memory_space<vmem>>, vector<1x1x96xf32>
    %76 = vector.shape_cast %75 : vector<1x1x96xf32> to vector<1x96xf32>
    %77 = vector.broadcast %76 : vector<1x96xf32> to vector<16x96xf32>
    %78 = arith.addf %74, %77 : vector<16x96xf32>
    %79 = vector.extract_strided_slice %78 {offsets = [0, 0], sizes = [16, 32], strides = [1, 1]} : vector<16x96xf32> to vector<16x32xf32>
    %80 = vector.extract_strided_slice %78 {offsets = [0, 32], sizes = [16, 32], strides = [1, 1]} : vector<16x96xf32> to vector<16x32xf32>
    %81 = vector.extract_strided_slice %78 {offsets = [0, 64], sizes = [16, 32], strides = [1, 1]} : vector<16x96xf32> to vector<16x32xf32>
    %82 = vector.extract_strided_slice %79 {offsets = [0, 0], sizes = [16, 16], strides = [1, 1]} : vector<16x32xf32> to vector<16x16xf32>
    %83 = arith.truncf %82 : vector<16x16xf32> to vector<16x16xbf16>
    %84 = vector.extract_strided_slice %80 {offsets = [0, 0], sizes = [16, 16], strides = [1, 1]} : vector<16x32xf32> to vector<16x16xf32>
    %85 = arith.truncf %84 : vector<16x16xf32> to vector<16x16xbf16>
    %86 = vector.extract_strided_slice %81 {offsets = [0, 0], sizes = [16, 16], strides = [1, 1]} : vector<16x32xf32> to vector<16x16xf32>
    %87 = arith.truncf %86 : vector<16x16xf32> to vector<16x16xbf16>
    %cst_34 = arith.constant dense<0.000000e+00> : vector<16x16xf32>
    %88 = tpu.matmul %83, %85, %cst_34 {dimension_numbers = #tpu.dot_dimension_numbers<[1], [1], [0], [0], [0, 0, 1, 0], [], []>} : vector<16x16xbf16>, vector<16x16xbf16>, vector<16x16xf32> -> vector<16x16xf32>
    %89 = arith.addf %88, %68 : vector<16x16xf32>
    %cst_35 = arith.constant dense<0xFF800000> : vector<16xf32>
    %90 = vector.multi_reduction <maximumf>, %89, %cst_35 [1] : vector<16x16xf32> to vector<16xf32>
    %91 = vector.shape_cast %90 : vector<16xf32> to vector<16x1xf32>
    %92 = vector.broadcast %91 : vector<16x1xf32> to vector<16x16xf32>
    %93 = arith.subf %89, %92 : vector<16x16xf32>
    %94 = math.exp %93 : vector<16x16xf32>
    %cst_36 = arith.constant dense<0.000000e+00> : vector<16xf32>
    %95 = vector.multi_reduction <add>, %94, %cst_36 [1] : vector<16x16xf32> to vector<16xf32>
    %96 = vector.shape_cast %95 : vector<16xf32> to vector<16x1xf32>
    %97 = tpu.reciprocal %96 {approx = true} : vector<16x1xf32> -> vector<16x1xf32>
    %98 = vector.broadcast %97 : vector<16x1xf32> to vector<16x16xf32>
    %99 = arith.mulf %94, %98 : vector<16x16xf32>
    %100 = arith.truncf %99 : vector<16x16xf32> to vector<16x16xbf16>
    %cst_37 = arith.constant dense<0.000000e+00> : vector<16x16xf32>
    %101 = tpu.matmul %100, %87, %cst_37 {dimension_numbers = #tpu.dot_dimension_numbers<[1], [0], [0], [1], [0, 0, 1, 1], [], []>} : vector<16x16xbf16>, vector<16x16xbf16>, vector<16x16xf32> -> vector<16x16xf32>
    %102 = arith.truncf %101 : vector<16x16xf32> to vector<16x16xbf16>
    %103 = vector.extract_strided_slice %70 {offsets = [0, 0], sizes = [16, 32], strides = [1, 1]} : vector<32x32xbf16> to vector<16x32xbf16>
    %cst_38 = arith.constant dense<0.000000e+00> : vector<16x32xf32>
    %104 = tpu.matmul %102, %103, %cst_38 {dimension_numbers = #tpu.dot_dimension_numbers<[1], [0], [0], [1], [0, 0, 1, 1], [], []>} : vector<16x16xbf16>, vector<16x32xbf16>, vector<16x32xf32> -> vector<16x32xf32>
    %105 = vector.extract_strided_slice %79 {offsets = [0, 16], sizes = [16, 16], strides = [1, 1]} : vector<16x32xf32> to vector<16x16xf32>
    %106 = arith.truncf %105 : vector<16x16xf32> to vector<16x16xbf16>
    %107 = vector.extract_strided_slice %80 {offsets = [0, 16], sizes = [16, 16], strides = [1, 1]} : vector<16x32xf32> to vector<16x16xf32>
    %108 = arith.truncf %107 : vector<16x16xf32> to vector<16x16xbf16>
    %109 = vector.extract_strided_slice %81 {offsets = [0, 16], sizes = [16, 16], strides = [1, 1]} : vector<16x32xf32> to vector<16x16xf32>
    %110 = arith.truncf %109 : vector<16x16xf32> to vector<16x16xbf16>
    %cst_39 = arith.constant dense<0.000000e+00> : vector<16x16xf32>
    %111 = tpu.matmul %106, %108, %cst_39 {dimension_numbers = #tpu.dot_dimension_numbers<[1], [1], [0], [0], [0, 0, 1, 0], [], []>} : vector<16x16xbf16>, vector<16x16xbf16>, vector<16x16xf32> -> vector<16x16xf32>
    %112 = arith.addf %111, %68 : vector<16x16xf32>
    %cst_40 = arith.constant dense<0xFF800000> : vector<16xf32>
    %113 = vector.multi_reduction <maximumf>, %112, %cst_40 [1] : vector<16x16xf32> to vector<16xf32>
    %114 = vector.shape_cast %113 : vector<16xf32> to vector<16x1xf32>
    %115 = vector.broadcast %114 : vector<16x1xf32> to vector<16x16xf32>
    %116 = arith.subf %112, %115 : vector<16x16xf32>
    %117 = math.exp %116 : vector<16x16xf32>
    %cst_41 = arith.constant dense<0.000000e+00> : vector<16xf32>
    %118 = vector.multi_reduction <add>, %117, %cst_41 [1] : vector<16x16xf32> to vector<16xf32>
    %119 = vector.shape_cast %118 : vector<16xf32> to vector<16x1xf32>
    %120 = tpu.reciprocal %119 {approx = true} : vector<16x1xf32> -> vector<16x1xf32>
    %121 = vector.broadcast %120 : vector<16x1xf32> to vector<16x16xf32>
    %122 = arith.mulf %117, %121 : vector<16x16xf32>
    %123 = arith.truncf %122 : vector<16x16xf32> to vector<16x16xbf16>
    %cst_42 = arith.constant dense<0.000000e+00> : vector<16x16xf32>
    %124 = tpu.matmul %123, %110, %cst_42 {dimension_numbers = #tpu.dot_dimension_numbers<[1], [0], [0], [1], [0, 0, 1, 1], [], []>} : vector<16x16xbf16>, vector<16x16xbf16>, vector<16x16xf32> -> vector<16x16xf32>
    %125 = arith.truncf %124 : vector<16x16xf32> to vector<16x16xbf16>
    %126 = vector.extract_strided_slice %70 {offsets = [16, 0], sizes = [16, 32], strides = [1, 1]} : vector<32x32xbf16> to vector<16x32xbf16>
    %cst_43 = arith.constant dense<0.000000e+00> : vector<16x32xf32>
    %127 = tpu.matmul %125, %126, %cst_43 {dimension_numbers = #tpu.dot_dimension_numbers<[1], [0], [0], [1], [0, 0, 1, 1], [], []>} : vector<16x16xbf16>, vector<16x32xbf16>, vector<16x32xf32> -> vector<16x32xf32>
    %128 = arith.addf %104, %127 : vector<16x32xf32>
    %c0_44 = arith.constant 0 : index
    %c0_45 = arith.constant 0 : index
    %c0_46 = arith.constant 0 : index
    %129 = vector.load %arg9[%c0_44, %c0_45, %c0_46] : memref<2x1x32xf32, #tpu.memory_space<vmem>>, vector<1x1x32xf32>
    %130 = vector.shape_cast %129 : vector<1x1x32xf32> to vector<1x32xf32>
    %131 = vector.broadcast %130 : vector<1x32xf32> to vector<16x32xf32>
    %132 = arith.addf %128, %131 : vector<16x32xf32>
    %133 = arith.addf %35, %132 : vector<16x32xf32>
    %c0_47 = arith.constant 0 : index
    %c0_48 = arith.constant 0 : index
    %c0_49 = arith.constant 0 : index
    %134 = vector.load %arg10[%c0_47, %c0_48, %c0_49] : memref<2x1x32xf32, #tpu.memory_space<vmem>>, vector<1x1x32xf32>
    %135 = vector.shape_cast %134 : vector<1x1x32xf32> to vector<1x32xf32>
    %c0_50 = arith.constant 0 : index
    %c0_51 = arith.constant 0 : index
    %c0_52 = arith.constant 0 : index
    %136 = vector.load %arg11[%c0_50, %c0_51, %c0_52] : memref<2x1x32xf32, #tpu.memory_space<vmem>>, vector<1x1x32xf32>
    %137 = vector.shape_cast %136 : vector<1x1x32xf32> to vector<1x32xf32>
    %cst_53 = arith.constant dense<0.000000e+00> : vector<16xf32>
    %138 = vector.multi_reduction <add>, %133, %cst_53 [1] : vector<16x32xf32> to vector<16xf32>
    %139 = vector.shape_cast %138 : vector<16xf32> to vector<16x1xf32>
    %cst_54 = arith.constant 3.200000e+01 : f32
    %140 = vector.broadcast %cst_54 : f32 to vector<16x1xf32>
    %141 = arith.divf %139, %140 : vector<16x1xf32>
    %142 = vector.broadcast %141 : vector<16x1xf32> to vector<16x32xf32>
    %143 = arith.subf %133, %142 : vector<16x32xf32>
    %144 = arith.mulf %143, %143 : vector<16x32xf32>
    %cst_55 = arith.constant dense<0.000000e+00> : vector<16xf32>
    %145 = vector.multi_reduction <add>, %144, %cst_55 [1] : vector<16x32xf32> to vector<16xf32>
    %146 = vector.shape_cast %145 : vector<16xf32> to vector<16x1xf32>
    %cst_56 = arith.constant 3.200000e+01 : f32
    %147 = vector.broadcast %cst_56 : f32 to vector<16x1xf32>
    %148 = arith.divf %146, %147 : vector<16x1xf32>
    %149 = vector.broadcast %141 : vector<16x1xf32> to vector<16x32xf32>
    %150 = arith.subf %133, %149 : vector<16x32xf32>
    %cst_57 = arith.constant 9.99999996E-13 : f32
    %151 = vector.broadcast %cst_57 : f32 to vector<16x1xf32>
    %152 = arith.addf %148, %151 : vector<16x1xf32>
    %153 = math.rsqrt %152 : vector<16x1xf32>
    %154 = vector.broadcast %153 : vector<16x1xf32> to vector<16x32xf32>
    %155 = arith.mulf %150, %154 : vector<16x32xf32>
    %156 = vector.broadcast %135 : vector<1x32xf32> to vector<16x32xf32>
    %157 = arith.mulf %155, %156 : vector<16x32xf32>
    %158 = vector.broadcast %137 : vector<1x32xf32> to vector<16x32xf32>
    %159 = arith.addf %157, %158 : vector<16x32xf32>
    %160 = arith.truncf %159 : vector<16x32xf32> to vector<16x32xbf16>
    %c0_58 = arith.constant 0 : index
    %c0_59 = arith.constant 0 : index
    %c0_60 = arith.constant 0 : index
    %161 = vector.load %arg12[%c0_58, %c0_59, %c0_60] : memref<2x32x64xbf16, #tpu.memory_space<vmem>>, vector<1x32x64xbf16>
    %162 = vector.shape_cast %161 : vector<1x32x64xbf16> to vector<32x64xbf16>
    %cst_61 = arith.constant dense<0.000000e+00> : vector<16x64xf32>
    %163 = tpu.matmul %160, %162, %cst_61 {dimension_numbers = #tpu.dot_dimension_numbers<[1], [0], [0], [1], [0, 0, 1, 1], [], []>} : vector<16x32xbf16>, vector<32x64xbf16>, vector<16x64xf32> -> vector<16x64xf32>
    %c0_62 = arith.constant 0 : index
    %c0_63 = arith.constant 0 : index
    %c0_64 = arith.constant 0 : index
    %164 = vector.load %arg13[%c0_62, %c0_63, %c0_64] : memref<2x1x64xf32, #tpu.memory_space<vmem>>, vector<1x1x64xf32>
    %165 = vector.shape_cast %164 : vector<1x1x64xf32> to vector<1x64xf32>
    %166 = vector.broadcast %165 : vector<1x64xf32> to vector<16x64xf32>
    %167 = arith.addf %163, %166 : vector<16x64xf32>
    %168 = arith.mulf %167, %167 : vector<16x64xf32>
    %169 = arith.mulf %167, %168 : vector<16x64xf32>
    %cst_65 = arith.constant 4.471500e-02 : f32
    %170 = vector.broadcast %cst_65 : f32 to vector<16x64xf32>
    %171 = arith.mulf %170, %169 : vector<16x64xf32>
    %172 = arith.addf %167, %171 : vector<16x64xf32>
    %cst_66 = arith.constant 0.797884583 : f32
    %173 = vector.broadcast %cst_66 : f32 to vector<16x64xf32>
    %174 = arith.mulf %173, %172 : vector<16x64xf32>
    %175 = math.tanh %174 : vector<16x64xf32>
    %cst_67 = arith.constant 1.000000e+00 : f32
    %176 = vector.broadcast %cst_67 : f32 to vector<16x64xf32>
    %177 = arith.addf %176, %175 : vector<16x64xf32>
    %cst_68 = arith.constant 5.000000e-01 : f32
    %178 = vector.broadcast %cst_68 : f32 to vector<16x64xf32>
    %179 = arith.mulf %178, %177 : vector<16x64xf32>
    %180 = arith.mulf %167, %179 : vector<16x64xf32>
    %181 = arith.truncf %180 : vector<16x64xf32> to vector<16x64xbf16>
    %c0_69 = arith.constant 0 : index
    %c0_70 = arith.constant 0 : index
    %c0_71 = arith.constant 0 : index
    %182 = vector.load %arg14[%c0_69, %c0_70, %c0_71] : memref<2x64x32xbf16, #tpu.memory_space<vmem>>, vector<1x64x32xbf16>
    %183 = vector.shape_cast %182 : vector<1x64x32xbf16> to vector<64x32xbf16>
    %cst_72 = arith.constant dense<0.000000e+00> : vector<16x32xf32>
    %184 = tpu.matmul %181, %183, %cst_72 {dimension_numbers = #tpu.dot_dimension_numbers<[1], [0], [0], [1], [0, 0, 1, 1], [], []>} : vector<16x64xbf16>, vector<64x32xbf16>, vector<16x32xf32> -> vector<16x32xf32>
    %c0_73 = arith.constant 0 : index
    %c0_74 = arith.constant 0 : index
    %c0_75 = arith.constant 0 : index
    %185 = vector.load %arg15[%c0_73, %c0_74, %c0_75] : memref<2x1x32xf32, #tpu.memory_space<vmem>>, vector<1x1x32xf32>
    %186 = vector.shape_cast %185 : vector<1x1x32xf32> to vector<1x32xf32>
    %187 = vector.broadcast %186 : vector<1x32xf32> to vector<16x32xf32>
    %188 = arith.addf %184, %187 : vector<16x32xf32>
    %189 = arith.addf %159, %188 : vector<16x32xf32>
    %c0_76 = arith.constant 0 : index
    %c0_77 = arith.constant 0 : index
    %c0_78 = arith.constant 0 : index
    %190 = vector.load %arg16[%c0_76, %c0_77, %c0_78] : memref<2x1x32xf32, #tpu.memory_space<vmem>>, vector<1x1x32xf32>
    %191 = vector.shape_cast %190 : vector<1x1x32xf32> to vector<1x32xf32>
    %c0_79 = arith.constant 0 : index
    %c0_80 = arith.constant 0 : index
    %c0_81 = arith.constant 0 : index
    %192 = vector.load %arg17[%c0_79, %c0_80, %c0_81] : memref<2x1x32xf32, #tpu.memory_space<vmem>>, vector<1x1x32xf32>
    %193 = vector.shape_cast %192 : vector<1x1x32xf32> to vector<1x32xf32>
    %cst_82 = arith.constant dense<0.000000e+00> : vector<16xf32>
    %194 = vector.multi_reduction <add>, %189, %cst_82 [1] : vector<16x32xf32> to vector<16xf32>
    %195 = vector.shape_cast %194 : vector<16xf32> to vector<16x1xf32>
    %cst_83 = arith.constant 3.200000e+01 : f32
    %196 = vector.broadcast %cst_83 : f32 to vector<16x1xf32>
    %197 = arith.divf %195, %196 : vector<16x1xf32>
    %198 = vector.broadcast %197 : vector<16x1xf32> to vector<16x32xf32>
    %199 = arith.subf %189, %198 : vector<16x32xf32>
    %200 = arith.mulf %199, %199 : vector<16x32xf32>
    %cst_84 = arith.constant dense<0.000000e+00> : vector<16xf32>
    %201 = vector.multi_reduction <add>, %200, %cst_84 [1] : vector<16x32xf32> to vector<16xf32>
    %202 = vector.shape_cast %201 : vector<16xf32> to vector<16x1xf32>
    %cst_85 = arith.constant 3.200000e+01 : f32
    %203 = vector.broadcast %cst_85 : f32 to vector<16x1xf32>
    %204 = arith.divf %202, %203 : vector<16x1xf32>
    %205 = vector.broadcast %197 : vector<16x1xf32> to vector<16x32xf32>
    %206 = arith.subf %189, %205 : vector<16x32xf32>
    %cst_86 = arith.constant 9.99999996E-13 : f32
    %207 = vector.broadcast %cst_86 : f32 to vector<16x1xf32>
    %208 = arith.addf %204, %207 : vector<16x1xf32>
    %209 = math.rsqrt %208 : vector<16x1xf32>
    %210 = vector.broadcast %209 : vector<16x1xf32> to vector<16x32xf32>
    %211 = arith.mulf %206, %210 : vector<16x32xf32>
    %212 = vector.broadcast %191 : vector<1x32xf32> to vector<16x32xf32>
    %213 = arith.mulf %211, %212 : vector<16x32xf32>
    %214 = vector.broadcast %193 : vector<1x32xf32> to vector<16x32xf32>
    %215 = arith.addf %213, %214 : vector<16x32xf32>
    %c1 = arith.constant 1 : index
    %c0_87 = arith.constant 0 : index
    %c0_88 = arith.constant 0 : index
    %216 = vector.load %arg8[%c1, %c0_87, %c0_88] : memref<2x32x32xbf16, #tpu.memory_space<vmem>>, vector<1x32x32xbf16>
    %217 = vector.shape_cast %216 : vector<1x32x32xbf16> to vector<32x32xbf16>
    %218 = arith.truncf %215 : vector<16x32xf32> to vector<16x32xbf16>
    %c1_89 = arith.constant 1 : index
    %c0_90 = arith.constant 0 : index
    %c0_91 = arith.constant 0 : index
    %219 = vector.load %arg6[%c1_89, %c0_90, %c0_91] : memref<2x32x96xbf16, #tpu.memory_space<vmem>>, vector<1x32x96xbf16>
    %220 = vector.shape_cast %219 : vector<1x32x96xbf16> to vector<32x96xbf16>
    %cst_92 = arith.constant dense<0.000000e+00> : vector<16x96xf32>
    %221 = tpu.matmul %218, %220, %cst_92 {dimension_numbers = #tpu.dot_dimension_numbers<[1], [0], [0], [1], [0, 0, 1, 1], [], []>} : vector<16x32xbf16>, vector<32x96xbf16>, vector<16x96xf32> -> vector<16x96xf32>
    %c1_93 = arith.constant 1 : index
    %c0_94 = arith.constant 0 : index
    %c0_95 = arith.constant 0 : index
    %222 = vector.load %arg7[%c1_93, %c0_94, %c0_95] : memref<2x1x96xf32, #tpu.memory_space<vmem>>, vector<1x1x96xf32>
    %223 = vector.shape_cast %222 : vector<1x1x96xf32> to vector<1x96xf32>
    %224 = vector.broadcast %223 : vector<1x96xf32> to vector<16x96xf32>
    %225 = arith.addf %221, %224 : vector<16x96xf32>
    %226 = vector.extract_strided_slice %225 {offsets = [0, 0], sizes = [16, 32], strides = [1, 1]} : vector<16x96xf32> to vector<16x32xf32>
    %227 = vector.extract_strided_slice %225 {offsets = [0, 32], sizes = [16, 32], strides = [1, 1]} : vector<16x96xf32> to vector<16x32xf32>
    %228 = vector.extract_strided_slice %225 {offsets = [0, 64], sizes = [16, 32], strides = [1, 1]} : vector<16x96xf32> to vector<16x32xf32>
    %229 = vector.extract_strided_slice %226 {offsets = [0, 0], sizes = [16, 16], strides = [1, 1]} : vector<16x32xf32> to vector<16x16xf32>
    %230 = arith.truncf %229 : vector<16x16xf32> to vector<16x16xbf16>
    %231 = vector.extract_strided_slice %227 {offsets = [0, 0], sizes = [16, 16], strides = [1, 1]} : vector<16x32xf32> to vector<16x16xf32>
    %232 = arith.truncf %231 : vector<16x16xf32> to vector<16x16xbf16>
    %233 = vector.extract_strided_slice %228 {offsets = [0, 0], sizes = [16, 16], strides = [1, 1]} : vector<16x32xf32> to vector<16x16xf32>
    %234 = arith.truncf %233 : vector<16x16xf32> to vector<16x16xbf16>
    %cst_96 = arith.constant dense<0.000000e+00> : vector<16x16xf32>
    %235 = tpu.matmul %230, %232, %cst_96 {dimension_numbers = #tpu.dot_dimension_numbers<[1], [1], [0], [0], [0, 0, 1, 0], [], []>} : vector<16x16xbf16>, vector<16x16xbf16>, vector<16x16xf32> -> vector<16x16xf32>
    %236 = arith.addf %235, %68 : vector<16x16xf32>
    %cst_97 = arith.constant dense<0xFF800000> : vector<16xf32>
    %237 = vector.multi_reduction <maximumf>, %236, %cst_97 [1] : vector<16x16xf32> to vector<16xf32>
    %238 = vector.shape_cast %237 : vector<16xf32> to vector<16x1xf32>
    %239 = vector.broadcast %238 : vector<16x1xf32> to vector<16x16xf32>
    %240 = arith.subf %236, %239 : vector<16x16xf32>
    %241 = math.exp %240 : vector<16x16xf32>
    %cst_98 = arith.constant dense<0.000000e+00> : vector<16xf32>
    %242 = vector.multi_reduction <add>, %241, %cst_98 [1] : vector<16x16xf32> to vector<16xf32>
    %243 = vector.shape_cast %242 : vector<16xf32> to vector<16x1xf32>
    %244 = tpu.reciprocal %243 {approx = true} : vector<16x1xf32> -> vector<16x1xf32>
    %245 = vector.broadcast %244 : vector<16x1xf32> to vector<16x16xf32>
    %246 = arith.mulf %241, %245 : vector<16x16xf32>
    %247 = arith.truncf %246 : vector<16x16xf32> to vector<16x16xbf16>
    %cst_99 = arith.constant dense<0.000000e+00> : vector<16x16xf32>
    %248 = tpu.matmul %247, %234, %cst_99 {dimension_numbers = #tpu.dot_dimension_numbers<[1], [0], [0], [1], [0, 0, 1, 1], [], []>} : vector<16x16xbf16>, vector<16x16xbf16>, vector<16x16xf32> -> vector<16x16xf32>
    %249 = arith.truncf %248 : vector<16x16xf32> to vector<16x16xbf16>
    %250 = vector.extract_strided_slice %217 {offsets = [0, 0], sizes = [16, 32], strides = [1, 1]} : vector<32x32xbf16> to vector<16x32xbf16>
    %cst_100 = arith.constant dense<0.000000e+00> : vector<16x32xf32>
    %251 = tpu.matmul %249, %250, %cst_100 {dimension_numbers = #tpu.dot_dimension_numbers<[1], [0], [0], [1], [0, 0, 1, 1], [], []>} : vector<16x16xbf16>, vector<16x32xbf16>, vector<16x32xf32> -> vector<16x32xf32>
    %252 = vector.extract_strided_slice %226 {offsets = [0, 16], sizes = [16, 16], strides = [1, 1]} : vector<16x32xf32> to vector<16x16xf32>
    %253 = arith.truncf %252 : vector<16x16xf32> to vector<16x16xbf16>
    %254 = vector.extract_strided_slice %227 {offsets = [0, 16], sizes = [16, 16], strides = [1, 1]} : vector<16x32xf32> to vector<16x16xf32>
    %255 = arith.truncf %254 : vector<16x16xf32> to vector<16x16xbf16>
    %256 = vector.extract_strided_slice %228 {offsets = [0, 16], sizes = [16, 16], strides = [1, 1]} : vector<16x32xf32> to vector<16x16xf32>
    %257 = arith.truncf %256 : vector<16x16xf32> to vector<16x16xbf16>
    %cst_101 = arith.constant dense<0.000000e+00> : vector<16x16xf32>
    %258 = tpu.matmul %253, %255, %cst_101 {dimension_numbers = #tpu.dot_dimension_numbers<[1], [1], [0], [0], [0, 0, 1, 0], [], []>} : vector<16x16xbf16>, vector<16x16xbf16>, vector<16x16xf32> -> vector<16x16xf32>
    %259 = arith.addf %258, %68 : vector<16x16xf32>
    %cst_102 = arith.constant dense<0xFF800000> : vector<16xf32>
    %260 = vector.multi_reduction <maximumf>, %259, %cst_102 [1] : vector<16x16xf32> to vector<16xf32>
    %261 = vector.shape_cast %260 : vector<16xf32> to vector<16x1xf32>
    %262 = vector.broadcast %261 : vector<16x1xf32> to vector<16x16xf32>
    %263 = arith.subf %259, %262 : vector<16x16xf32>
    %264 = math.exp %263 : vector<16x16xf32>
    %cst_103 = arith.constant dense<0.000000e+00> : vector<16xf32>
    %265 = vector.multi_reduction <add>, %264, %cst_103 [1] : vector<16x16xf32> to vector<16xf32>
    %266 = vector.shape_cast %265 : vector<16xf32> to vector<16x1xf32>
    %267 = tpu.reciprocal %266 {approx = true} : vector<16x1xf32> -> vector<16x1xf32>
    %268 = vector.broadcast %267 : vector<16x1xf32> to vector<16x16xf32>
    %269 = arith.mulf %264, %268 : vector<16x16xf32>
    %270 = arith.truncf %269 : vector<16x16xf32> to vector<16x16xbf16>
    %cst_104 = arith.constant dense<0.000000e+00> : vector<16x16xf32>
    %271 = tpu.matmul %270, %257, %cst_104 {dimension_numbers = #tpu.dot_dimension_numbers<[1], [0], [0], [1], [0, 0, 1, 1], [], []>} : vector<16x16xbf16>, vector<16x16xbf16>, vector<16x16xf32> -> vector<16x16xf32>
    %272 = arith.truncf %271 : vector<16x16xf32> to vector<16x16xbf16>
    %273 = vector.extract_strided_slice %217 {offsets = [16, 0], sizes = [16, 32], strides = [1, 1]} : vector<32x32xbf16> to vector<16x32xbf16>
    %cst_105 = arith.constant dense<0.000000e+00> : vector<16x32xf32>
    %274 = tpu.matmul %272, %273, %cst_105 {dimension_numbers = #tpu.dot_dimension_numbers<[1], [0], [0], [1], [0, 0, 1, 1], [], []>} : vector<16x16xbf16>, vector<16x32xbf16>, vector<16x32xf32> -> vector<16x32xf32>
    %275 = arith.addf %251, %274 : vector<16x32xf32>
    %c1_106 = arith.constant 1 : index
    %c0_107 = arith.constant 0 : index
    %c0_108 = arith.constant 0 : index
    %276 = vector.load %arg9[%c1_106, %c0_107, %c0_108] : memref<2x1x32xf32, #tpu.memory_space<vmem>>, vector<1x1x32xf32>
    %277 = vector.shape_cast %276 : vector<1x1x32xf32> to vector<1x32xf32>
    %278 = vector.broadcast %277 : vector<1x32xf32> to vector<16x32xf32>
    %279 = arith.addf %275, %278 : vector<16x32xf32>
    %280 = arith.addf %215, %279 : vector<16x32xf32>
    %c1_109 = arith.constant 1 : index
    %c0_110 = arith.constant 0 : index
    %c0_111 = arith.constant 0 : index
    %281 = vector.load %arg10[%c1_109, %c0_110, %c0_111] : memref<2x1x32xf32, #tpu.memory_space<vmem>>, vector<1x1x32xf32>
    %282 = vector.shape_cast %281 : vector<1x1x32xf32> to vector<1x32xf32>
    %c1_112 = arith.constant 1 : index
    %c0_113 = arith.constant 0 : index
    %c0_114 = arith.constant 0 : index
    %283 = vector.load %arg11[%c1_112, %c0_113, %c0_114] : memref<2x1x32xf32, #tpu.memory_space<vmem>>, vector<1x1x32xf32>
    %284 = vector.shape_cast %283 : vector<1x1x32xf32> to vector<1x32xf32>
    %cst_115 = arith.constant dense<0.000000e+00> : vector<16xf32>
    %285 = vector.multi_reduction <add>, %280, %cst_115 [1] : vector<16x32xf32> to vector<16xf32>
    %286 = vector.shape_cast %285 : vector<16xf32> to vector<16x1xf32>
    %cst_116 = arith.constant 3.200000e+01 : f32
    %287 = vector.broadcast %cst_116 : f32 to vector<16x1xf32>
    %288 = arith.divf %286, %287 : vector<16x1xf32>
    %289 = vector.broadcast %288 : vector<16x1xf32> to vector<16x32xf32>
    %290 = arith.subf %280, %289 : vector<16x32xf32>
    %291 = arith.mulf %290, %290 : vector<16x32xf32>
    %cst_117 = arith.constant dense<0.000000e+00> : vector<16xf32>
    %292 = vector.multi_reduction <add>, %291, %cst_117 [1] : vector<16x32xf32> to vector<16xf32>
    %293 = vector.shape_cast %292 : vector<16xf32> to vector<16x1xf32>
    %cst_118 = arith.constant 3.200000e+01 : f32
    %294 = vector.broadcast %cst_118 : f32 to vector<16x1xf32>
    %295 = arith.divf %293, %294 : vector<16x1xf32>
    %296 = vector.broadcast %288 : vector<16x1xf32> to vector<16x32xf32>
    %297 = arith.subf %280, %296 : vector<16x32xf32>
    %cst_119 = arith.constant 9.99999996E-13 : f32
    %298 = vector.broadcast %cst_119 : f32 to vector<16x1xf32>
    %299 = arith.addf %295, %298 : vector<16x1xf32>
    %300 = math.rsqrt %299 : vector<16x1xf32>
    %301 = vector.broadcast %300 : vector<16x1xf32> to vector<16x32xf32>
    %302 = arith.mulf %297, %301 : vector<16x32xf32>
    %303 = vector.broadcast %282 : vector<1x32xf32> to vector<16x32xf32>
    %304 = arith.mulf %302, %303 : vector<16x32xf32>
    %305 = vector.broadcast %284 : vector<1x32xf32> to vector<16x32xf32>
    %306 = arith.addf %304, %305 : vector<16x32xf32>
    %307 = arith.truncf %306 : vector<16x32xf32> to vector<16x32xbf16>
    %c1_120 = arith.constant 1 : index
    %c0_121 = arith.constant 0 : index
    %c0_122 = arith.constant 0 : index
    %308 = vector.load %arg12[%c1_120, %c0_121, %c0_122] : memref<2x32x64xbf16, #tpu.memory_space<vmem>>, vector<1x32x64xbf16>
    %309 = vector.shape_cast %308 : vector<1x32x64xbf16> to vector<32x64xbf16>
    %cst_123 = arith.constant dense<0.000000e+00> : vector<16x64xf32>
    %310 = tpu.matmul %307, %309, %cst_123 {dimension_numbers = #tpu.dot_dimension_numbers<[1], [0], [0], [1], [0, 0, 1, 1], [], []>} : vector<16x32xbf16>, vector<32x64xbf16>, vector<16x64xf32> -> vector<16x64xf32>
    %c1_124 = arith.constant 1 : index
    %c0_125 = arith.constant 0 : index
    %c0_126 = arith.constant 0 : index
    %311 = vector.load %arg13[%c1_124, %c0_125, %c0_126] : memref<2x1x64xf32, #tpu.memory_space<vmem>>, vector<1x1x64xf32>
    %312 = vector.shape_cast %311 : vector<1x1x64xf32> to vector<1x64xf32>
    %313 = vector.broadcast %312 : vector<1x64xf32> to vector<16x64xf32>
    %314 = arith.addf %310, %313 : vector<16x64xf32>
    %315 = arith.mulf %314, %314 : vector<16x64xf32>
    %316 = arith.mulf %314, %315 : vector<16x64xf32>
    %cst_127 = arith.constant 4.471500e-02 : f32
    %317 = vector.broadcast %cst_127 : f32 to vector<16x64xf32>
    %318 = arith.mulf %317, %316 : vector<16x64xf32>
    %319 = arith.addf %314, %318 : vector<16x64xf32>
    %cst_128 = arith.constant 0.797884583 : f32
    %320 = vector.broadcast %cst_128 : f32 to vector<16x64xf32>
    %321 = arith.mulf %320, %319 : vector<16x64xf32>
    %322 = math.tanh %321 : vector<16x64xf32>
    %cst_129 = arith.constant 1.000000e+00 : f32
    %323 = vector.broadcast %cst_129 : f32 to vector<16x64xf32>
    %324 = arith.addf %323, %322 : vector<16x64xf32>
    %cst_130 = arith.constant 5.000000e-01 : f32
    %325 = vector.broadcast %cst_130 : f32 to vector<16x64xf32>
    %326 = arith.mulf %325, %324 : vector<16x64xf32>
    %327 = arith.mulf %314, %326 : vector<16x64xf32>
    %328 = arith.truncf %327 : vector<16x64xf32> to vector<16x64xbf16>
    %c1_131 = arith.constant 1 : index
    %c0_132 = arith.constant 0 : index
    %c0_133 = arith.constant 0 : index
    %329 = vector.load %arg14[%c1_131, %c0_132, %c0_133] : memref<2x64x32xbf16, #tpu.memory_space<vmem>>, vector<1x64x32xbf16>
    %330 = vector.shape_cast %329 : vector<1x64x32xbf16> to vector<64x32xbf16>
    %cst_134 = arith.constant dense<0.000000e+00> : vector<16x32xf32>
    %331 = tpu.matmul %328, %330, %cst_134 {dimension_numbers = #tpu.dot_dimension_numbers<[1], [0], [0], [1], [0, 0, 1, 1], [], []>} : vector<16x64xbf16>, vector<64x32xbf16>, vector<16x32xf32> -> vector<16x32xf32>
    %c1_135 = arith.constant 1 : index
    %c0_136 = arith.constant 0 : index
    %c0_137 = arith.constant 0 : index
    %332 = vector.load %arg15[%c1_135, %c0_136, %c0_137] : memref<2x1x32xf32, #tpu.memory_space<vmem>>, vector<1x1x32xf32>
    %333 = vector.shape_cast %332 : vector<1x1x32xf32> to vector<1x32xf32>
    %334 = vector.broadcast %333 : vector<1x32xf32> to vector<16x32xf32>
    %335 = arith.addf %331, %334 : vector<16x32xf32>
    %336 = arith.addf %306, %335 : vector<16x32xf32>
    %c1_138 = arith.constant 1 : index
    %c0_139 = arith.constant 0 : index
    %c0_140 = arith.constant 0 : index
    %337 = vector.load %arg16[%c1_138, %c0_139, %c0_140] : memref<2x1x32xf32, #tpu.memory_space<vmem>>, vector<1x1x32xf32>
    %338 = vector.shape_cast %337 : vector<1x1x32xf32> to vector<1x32xf32>
    %c1_141 = arith.constant 1 : index
    %c0_142 = arith.constant 0 : index
    %c0_143 = arith.constant 0 : index
    %339 = vector.load %arg17[%c1_141, %c0_142, %c0_143] : memref<2x1x32xf32, #tpu.memory_space<vmem>>, vector<1x1x32xf32>
    %340 = vector.shape_cast %339 : vector<1x1x32xf32> to vector<1x32xf32>
    %cst_144 = arith.constant dense<0.000000e+00> : vector<16xf32>
    %341 = vector.multi_reduction <add>, %336, %cst_144 [1] : vector<16x32xf32> to vector<16xf32>
    %342 = vector.shape_cast %341 : vector<16xf32> to vector<16x1xf32>
    %cst_145 = arith.constant 3.200000e+01 : f32
    %343 = vector.broadcast %cst_145 : f32 to vector<16x1xf32>
    %344 = arith.divf %342, %343 : vector<16x1xf32>
    %345 = vector.broadcast %344 : vector<16x1xf32> to vector<16x32xf32>
    %346 = arith.subf %336, %345 : vector<16x32xf32>
    %347 = arith.mulf %346, %346 : vector<16x32xf32>
    %cst_146 = arith.constant dense<0.000000e+00> : vector<16xf32>
    %348 = vector.multi_reduction <add>, %347, %cst_146 [1] : vector<16x32xf32> to vector<16xf32>
    %349 = vector.shape_cast %348 : vector<16xf32> to vector<16x1xf32>
    %cst_147 = arith.constant 3.200000e+01 : f32
    %350 = vector.broadcast %cst_147 : f32 to vector<16x1xf32>
    %351 = arith.divf %349, %350 : vector<16x1xf32>
    %352 = vector.broadcast %344 : vector<16x1xf32> to vector<16x32xf32>
    %353 = arith.subf %336, %352 : vector<16x32xf32>
    %cst_148 = arith.constant 9.99999996E-13 : f32
    %354 = vector.broadcast %cst_148 : f32 to vector<16x1xf32>
    %355 = arith.addf %351, %354 : vector<16x1xf32>
    %356 = math.rsqrt %355 : vector<16x1xf32>
    %357 = vector.broadcast %356 : vector<16x1xf32> to vector<16x32xf32>
    %358 = arith.mulf %353, %357 : vector<16x32xf32>
    %359 = vector.broadcast %338 : vector<1x32xf32> to vector<16x32xf32>
    %360 = arith.mulf %358, %359 : vector<16x32xf32>
    %361 = vector.broadcast %340 : vector<1x32xf32> to vector<16x32xf32>
    %362 = arith.addf %360, %361 : vector<16x32xf32>
    %363 = vector.extract_strided_slice %362 {offsets = [0, 0], sizes = [1, 32], strides = [1, 1]} : vector<16x32xf32> to vector<1x32xf32>
    %364 = vector.extract_strided_slice %362 {offsets = [8, 0], sizes = [1, 32], strides = [1, 1]} : vector<16x32xf32> to vector<1x32xf32>
    %365 = tpu.concatenate %363, %364 in 0 : vector<1x32xf32>, vector<1x32xf32> -> vector<2x32xf32>
    %366 = arith.truncf %365 : vector<2x32xf32> to vector<2x32xbf16>
    %c0_149 = arith.constant 0 : index
    %c0_150 = arith.constant 0 : index
    %367 = vector.load %arg18[%c0_149, %c0_150] : memref<32x32xbf16, #tpu.memory_space<vmem>>, vector<32x32xbf16>
    %cst_151 = arith.constant dense<0.000000e+00> : vector<2x32xf32>
    %368 = tpu.matmul %366, %367, %cst_151 {dimension_numbers = #tpu.dot_dimension_numbers<[1], [0], [0], [1], [0, 0, 1, 1], [], []>} : vector<2x32xbf16>, vector<32x32xbf16>, vector<2x32xf32> -> vector<2x32xf32>
    %c0_152 = arith.constant 0 : index
    %c0_153 = arith.constant 0 : index
    %369 = vector.load %arg19[%c0_152, %c0_153] : memref<1x32xf32, #tpu.memory_space<vmem>>, vector<1x32xf32>
    %370 = vector.broadcast %369 : vector<1x32xf32> to vector<2x32xf32>
    %371 = arith.addf %368, %370 : vector<2x32xf32>
    %372 = math.tanh %371 : vector<2x32xf32>
    %c0_154 = arith.constant 0 : index
    %c0_155 = arith.constant 0 : index
    %373 = vector.load %arg20[%c0_154, %c0_155] : memref<1x32xf32, #tpu.memory_space<vmem>>, vector<1x32xf32>
    %374 = vector.broadcast %373 : vector<1x32xf32> to vector<2x32xf32>
    %375 = arith.mulf %372, %374 : vector<2x32xf32>
    %cst_156 = arith.constant dense<0.000000e+00> : vector<2xf32>
    %376 = vector.multi_reduction <add>, %375, %cst_156 [1] : vector<2x32xf32> to vector<2xf32>
    %377 = vector.shape_cast %376 : vector<2xf32> to vector<2x1xf32>
    %c0_157 = arith.constant 0 : index
    %c0_158 = arith.constant 0 : index
    %378 = vector.load %arg21[%c0_157, %c0_158] : memref<1x1xf32, #tpu.memory_space<vmem>>, vector<1x1xf32>
    %379 = vector.broadcast %378 : vector<1x1xf32> to vector<2x1xf32>
    %380 = arith.addf %377, %379 : vector<2x1xf32>
    %c0_159 = arith.constant 0 : index
    %c0_160 = arith.constant 0 : index
    %381 = vector.load %arg22[%c0_159, %c0_160] : memref<2x1xf32, #tpu.memory_space<vmem>>, vector<2x1xf32>
    tpu.vector_store %arg22[%c0_159, %c0_160], %380 {strides = array<i32>} : memref<2x1xf32, #tpu.memory_space<vmem>>, vector<2x1xf32>,
    return
  }
}

</mosaic_0001>

<bundles_post_ra>
// kernel: molformer_regressor_forward.1
= control target key start
LH: loop header
LB: loop body
LE: loop exit
PB: predicated region body
PF: predicated region fallthrough
CT: control target
= control target key end

     0   :  { %v76_v0 = vlaneseq  ;;  %v2177_v1 = vmov 0   ;;  %v2178_v4 = vmov 0.0   ;;  %vm2179_vm1 = vmmov 0   ;;  %s2180_s24 = smov 96   ;;  %s2183_s25 = smov 64   ;;  %s2668_s1 = inlined_call_operand.vmem [shape: f32[1,16], index: 1, kind: input, shape index: {}]   ;;  %s2669_s0 = inlined_call_operand.vmem [shape: s32[16,1], index: 0, kind: input, shape index: {}]   ;;  %s2670_s2 = inlined_call_operand.vmem [shape: bf16[100,32], index: 2, kind: input, shape index: {}]   ;;  %s2671_s3 = inlined_call_operand.vmem [shape: f32[8,32], index: 3, kind: input, shape index: {}]   ;;  %s2672_s6 = inlined_call_operand.vmem [shape: bf16[2,32,96], index: 6, kind: input, shape index: {}]   ;;  %s2673_s4 = inlined_call_operand.vmem [shape: f32[1,32], index: 4, kind: input, shape index: {}]   ;;  %s2674_s5 = inlined_call_operand.vmem [shape: f32[1,32], index: 5, kind: input, shape index: {}]   ;;  %s2675_s7 = inlined_call_operand.vmem [shape: f32[2,1,96], index: 7, kind: input, shape index: {}]   ;;  %s2676_s8 = inlined_call_operand.vmem [shape: bf16[2,32,32], index: 8, kind: input, shape index: {}]   ;;  %s2677_s9 = inlined_call_operand.vmem [shape: f32[2,1,32], index: 9, kind: input, shape index: {}]   ;;  %s2678_s12 = inlined_call_operand.vmem [shape: bf16[2,32,64], index: 12, kind: input, shape index: {}]   ;;  %s2679_s10 = inlined_call_operand.vmem [shape: f32[2,1,32], index: 10, kind: input, shape index: {}]   ;;  %s2680_s11 = inlined_call_operand.vmem [shape: f32[2,1,32], index: 11, kind: input, shape index: {}]   ;;  %s2681_s14 = inlined_call_operand.vmem [shape: bf16[2,64,32], index: 14, kind: input, shape index: {}]   ;;  %s2682_s13 = inlined_call_operand.vmem [shape: f32[2,1,64], index: 13, kind: input, shape index: {}]   ;;  %s2683_s15 = inlined_call_operand.vmem [shape: f32[2,1,32], index: 15, kind: input, shape index: {}]   ;;  %s2684_s16 = inlined_call_operand.vmem [shape: f32[2,1,32], index: 16, kind: input, shape index: {}]   ;;  %s2685_s17 = inlined_call_operand.vmem [shape: f32[2,1,32], index: 17, kind: input, shape index: {}]   ;;  %s2686_s18 = inlined_call_operand.vmem [shape: bf16[32,32], index: 18, kind: input, shape index: {}]   ;;  %s2687_s21 = inlined_call_operand.<no memory space> [shape: f32[1,1], index: 21, kind: input, shape index: {}]   ;;  %s2688_s19 = inlined_call_operand.vmem [shape: f32[1,32], index: 19, kind: input, shape index: {}]   ;;  %s2689_s20 = inlined_call_operand.vmem [shape: f32[1,32], index: 20, kind: input, shape index: {}]   ;;  %s2690_s22 = inlined_call_operand.vmem [shape: f32[2,1], index: 22, kind: output, shape index: {}]  }
   0x1   :  { %2694 = sst [smem:[#allocation3_spill]] %s2668_s1  ;;  %2085 = vset.pattern.permute.xlu0 %v2177_v1  ;;  %1922 = vmatprep.subr.bf16.mxu0 %v2178_v4  ;;  %vm148_vm2 = vcmask 1041408   ;;  %vm144_vm5 = vcmask 818176   ;;  %vm195_vm6 = vcmask 261120   ;;  %v1777_v62 = vld [vmem:[%s2675_s7] ss:$0 sm:$0xff] }
   0x2   :  { %2695 = sst [smem:[#allocation4_spill]] %s2669_s0  ;;  %s2701_s29 = sld [smem:[#allocation3_spill]]  ;;  %v270_v5 = vshrl.u32 %v76_v0, 7  ;;  %1940 = vmatprep.subr.bf16.mxu1 %v2178_v4  ;;  %1936 = vmatprep.mubr.msk.bf16.mxu0 %vm2179_vm1, %v2178_v4  ;;  %v2346_v18 = vand.u32 127, %v76_v0  ;;  %vm354_vm7 = vcmask 130048   ;;  %vm876_vm15 = vcmask 523264  }
   0x3   :  { %2696 = sst [smem:[#allocation5_spill]] %s2670_s2  ;;  %s2702_s1 = sld [smem:[#allocation4_spill]]  ;;  %1944 = vmatprep.mubr.msk.bf16.mxu1 %vm2179_vm1, %v2178_v4 }
   0x4   :  { %2697 = sst [smem:[#allocation6_spill]] %s2671_s3  ;;  %v271_v9 = vsub.s32 0, %v270_v5  ;;  %vm259_vm8 = vcmp.ge.s32.totalorder %v2346_v18, 8  ;;  %vm260_vm9 = vcmp.lt.s32.totalorder %v2346_v18, 16  ;;  %vm249_vm10 = vcmp.lt.s32.totalorder %v2346_v18, 8  ;;  %s2184_s26 = smov 112  }
   0x5   :  { %2698 = sst [smem:[#allocation7_spill]] %s2672_s6  ;;  %vm261_vm12 = vmand %vm259_vm8, %vm260_vm9  ;;  %s2185_s27 = smov 48  }
   0x6   :  { %2699 = sst [smem:[#allocation8_spill]] %s2673_s4  ;;  %s2703_s4 = sld [smem:[#allocation5_spill]] }
   0x7   :  { %2700 = sst [smem:[#allocation9_spill]] %s2674_s5  ;;  %s2704_s5 = sld [smem:[#allocation6_spill]] }
   0x8   :  { %v266_v2 = vld [vmem:[%s2701_s29] sm:$0x1]  ;;  %s2705_s2 = sld [smem:[#allocation7_spill]]  ;;  %s2706_s30 = sld [smem:[#allocation8_spill]] }
   0x9   :  { %v74_v3 = vld [vmem:[%s2702_s1] sm:$0xff]  ;;  %vm267_vm0 = vcmp.gt.f32.partialorder %v266_v2, 0.5  ;;  %v75_v8 = vld [vmem:[%s2702_s1 + $0x8] sm:$0xff]  ;;  %s2707_s23 = sld [smem:[#allocation9_spill]] }
   0xa   :  { %79 = vperm.xlu0 %2085, %v74_v3   ;;  %v268_v7 = vsel %vm267_vm0, 1, %v2177_v1  ;;  %vm1669_vm0 = vcmask 1040384  }
   0xb   :  { %v2319_v11 = vrot.slane %v268_v7, %v271_v9  ;;  %v2181_v9 = vmov -1e+09  }
   0xc   :  { %v2086_v6 = vld [vmem:[%s2703_s4] sm:$0xff]   ;;  %v2087_v10 = vld [vmem:[%s2703_s4 + $0x8] sm:$0xff]   ;;  %v2088_v12 = vld [vmem:[%s2703_s4 + $0x10] sm:$0xff]  }
   0xd   :  { %1923 = vmatpush3.bf16.msra.mxu0 %v2086_v6  ;;  %v2089_v13 = vld [vmem:[%s2703_s4 + $0x18] sm:$0xff]   ;;  %v2090_v14 = vld [vmem:[%s2703_s4 + $0x20] sm:$0xff]   ;;  %v2091_v15 = vld [vmem:[%s2703_s4 + $0x28] sm:$0xff]   ;;  %vm273_vm11 = vcmp.eq.s32.totalorder %v2319_v11, 1 }
   0xe   :  { %1924 = vmatprep.subr.bf16.mxu0 %v2178_v4  ;;  %82 = vperm.xlu0 %2085, %v75_v8   ;;  %v2092_v16 = vld [vmem:[%s2703_s4 + $0x30] ss:$0 sps:$4 sm:$0x33]   ;;  %v104_v24 = vld [vmem:[%s2704_s5] sm:$0xff]  ;;  %v2094_v44 = vld [vmem:[%s2705_s2 + $0x8] sm:$0xff]   ;;  %s2182_s5 = smov 80  }
   0xf   :  { %v150_v17 = vsel %vm148_vm2, %v2092_v16, 0  ;;  %v2093_v43 = vld [vmem:[%s2705_s2] sm:$0xff]   ;;  %vm274_vm13 = vmand %vm249_vm10, %vm273_vm11  ;;  %vm1759_vm2 = vcmask 1024  }
  0x10   :  { %1941 = vmatpush3.bf16.msra.mxu1 %v2093_v43  ;;  %v1775_v53 = vld [vmem:[%s2706_s30] ss:$0 sm:$0xff]  ;;  %vm275_vm14 = vmand %vm261_vm12, %vm273_vm11 }
  0x11   :  { %1925 = vmatpush3.bf16.msra.mxu0 %v2087_v10  ;;  %1942 = vmatprep.subr.bf16.mxu1 %v2178_v4  ;;  %v1776_v57 = vld [vmem:[%s2707_s23] ss:$0 sm:$0xff]  ;;  %v2401_v10 = vsel %vm274_vm13, 0.0, %v2181_v9 }
  0x12   :  { %1926 = vmatprep.subr.bf16.mxu0 %v2178_v4 }
  0x14   :  { %1943 = vmatpush3.bf16.msra.mxu1 %v2094_v44 }
  0x15   :  { %1927 = vmatpush3.bf16.msra.mxu0 %v2088_v12  ;;  %1948 = vmatprep.subr.bf16.mxu1 %v2178_v4 }
  0x16   :  { %1928 = vmatprep.subr.bf16.mxu0 %v2178_v4 }
  0x19   :  { %1929 = vmatpush3.bf16.msra.mxu0 %v2089_v13  ;;  %v2403_v13 = vsel %vm275_vm14, 0.0, %v2181_v9 }
  0x1a   :  { %1930 = vmatprep.subr.bf16.mxu0 %v2178_v4 }
  0x1d   :  { %1931 = vmatpush3.bf16.msra.mxu0 %v2090_v14 }
  0x1e   :  { %1932 = vmatprep.subr.bf16.mxu0 %v2178_v4 }
  0x21   :  { %1933 = vmatpush3.bf16.msra.mxu0 %v2091_v15 }
  0x22   :  { %1934 = vmatprep.subr.bf16.mxu0 %v2178_v4 }
  0x25   :  { %1935 = vmatpush3.bf16.msra.mxu0 %v150_v17 }
  0x26   :  { %1966 = vmatprep.subr.bf16.mxu0 %v2178_v4 }
  0x89   :  { %v80_v19 = vpop.permute.xlu0 %79 }
  0x8a   :  { %vm84_vm3 = vcmp.eq.s32.totalorder %v80_v19, %v2346_v18 }
  0x8b   :  { %v1765_v21 = vsel %vm84_vm3, 1.0, %v2178_v4 }
  0x8d   :  { %v83_v20 = vpop.permute.xlu0 %82 }
  0x8e   :  { %vm85_vm4 = vcmp.eq.s32.totalorder %v83_v20, %v2346_v18 }
  0x8f   :  { %v1766_v22 = vsel %vm85_vm4, 1.0, %v2178_v4 }
  0x90   :  { %v90_v23 = vpack.c.bf16 %v1766_v22, %v1765_v21 }
  0x92   :  { %1937 = vmatmul.mubr.msk.bf16.vlgmr.msra.gmra.mrb[0].mxu0 %vm144_vm5, %v90_v23 }
  0x93   :  { %1968 = vmatprep.mubr.msk.bf16.mxu0 %vm2179_vm1, %v2178_v4 }
 0x165   :  { %v186_v25 = vpop.f32.mrb[0].mxu0 }
 0x166   :  { %v187_v26 = vadd.f32 %v186_v25, %v104_v24  ;;  %v1938_v27 = vpop.f32.mrb[1].mxu0 }
 0x167   :  { %v189_v28 = vpop.f32.mrb[2].mxu0 }
 0x168   :  { %v190_v29 = vadd.f32 %v189_v28, %v104_v24  ;;  %v1939_v30 = vpop.f32.mrb[3].mxu0  ;;  %v196_v31 = vsel %vm195_vm6, %v187_v26, 0.0 }
 0x169   :  { %197 = vadd.xlane.f32.xlu1 %v196_v31 }
 0x16a   :  { %v199_v32 = vsel %vm195_vm6, %v190_v29, 0.0 }
 0x16d   :  { %200 = vadd.xlane.f32.xlu1 %v199_v32 }
 0x1f6   :  { %v198_v33 = vpop.xlane.xlu1 %197 }
 0x1f7   :  { %v203_v34 = vmul.f32 0.03125, %v198_v33 }
 0x1f9   :  { %v205_v35 = vsub.f32 %v187_v26, %v203_v34 }
 0x1fa   :  { %v201_v36 = vpop.xlane.xlu1 %200 }
 0x1fb   :  { %v204_v37 = vmul.f32 0.03125, %v201_v36  ;;  %v207_v38 = vmul.f32 %v205_v35, %v205_v35 }
 0x1fd   :  { %v206_v39 = vsub.f32 %v190_v29, %v204_v37  ;;  %v209_v40 = vsel %vm195_vm6, %v207_v38, 0.0 }
 0x1fe   :  { %210 = vadd.xlane.f32.xlu0 %v209_v40 }
 0x1ff   :  { %v208_v41 = vmul.f32 %v206_v39, %v206_v39 }
 0x201   :  { %v212_v42 = vsel %vm195_vm6, %v208_v41, 0.0 }
 0x202   :  { %213 = vadd.xlane.f32.xlu1 %v212_v42 }
 0x28b   :  { %v211_v45 = vpop.xlane.xlu0 %210 }
 0x28c   :  { %v215_v46 = vmul.f32 0.03125, %v211_v45 }
 0x28e   :  { %v217_v47 = vadd.f32 1e-12, %v215_v46 }
 0x28f   :  { %v214_v48 = vpop.xlane.xlu1 %213 }
 0x290   :  { %2115 = vrsqrt.f32 %v217_v47  ;;  %v216_v49 = vmul.f32 0.03125, %v214_v48 }
 0x292   :  { %v218_v50 = vadd.f32 1e-12, %v216_v49 }
 0x294   :  { %2117 = vrsqrt.f32 %v218_v50 }
 0x29a   :  { %v2116_v51 = vpop.eup %2115 }
 0x29b   :  { %v221_v52 = vmul.f32 %v2116_v51, %v205_v35 }
 0x29d   :  { %v229_v56 = vmul.f32 %v1775_v53, %v221_v52 }
 0x29e   :  { %v2118_v54 = vpop.eup %2117 }
 0x29f   :  { %v222_v55 = vmul.f32 %v2118_v54, %v206_v39  ;;  %v2375_v59 = vadd.f32 %v1776_v57, %v229_v56 }
 0x2a1   :  { %v230_v58 = vmul.f32 %v1775_v53, %v222_v55 }
 0x2a3   :  { %v2377_v60 = vadd.f32 %v1776_v57, %v230_v58 }
 0x2a5   :  { %v282_v61 = vpack.c.bf16 %v2377_v60, %v2375_v59 }
 0x2a7   :  { %1945 = vmatmul.mubr.msk.bf16.vlgmr.msra.gmra.mrb[0].mxu1 %vm195_vm6, %v282_v61 }
 0x2a8   :  { %1950 = vmatprep.mubr.msk.bf16.mxu1 %vm2179_vm1, %v2178_v4 }
 0x37a   :  { %v343_v63 = vpop.f32.mrb[0].mxu1 }
 0x37b   :  { %v1946_v0 = vpop.f32.mrb[1].mxu1  ;;  %v344_v2 = vadd.f32 %v1777_v62, %v343_v63 }
 0x37c   :  { %v346_v1 = vpop.f32.mrb[2].mxu1 }
 0x37d   :  { %v347_v3 = vadd.f32 %v1777_v62, %v346_v1  ;;  %v1947_v5 = vpop.f32.mrb[3].mxu1 }
 0x37f   :  { %v2387_v6 = vpack.c.bf16 %v347_v3, %v344_v2 }
 0x381   :  { %352 = vrot.lane.b32.xlu1 %v2387_v6, %s2180_s24 }
 0x3f3   :  { %v353_v7 = vpop.permute.xlu1 %352 }
 0x3f4   :  { %v359_v8 = vsel %vm354_vm7, %v353_v7, 0 }
 0x3f5   :  { %1949 = vmatpush3.bf16.xpose.msra.mxu1 %v359_v8 }
 0x3f6   :  { %1954 = vmatprep.subr.bf16.mxu1 %v2178_v4 }
 0x3fc   :  { %1951 = vmatmul.mubr.msk.bf16.vlgmr.msra.gmra.mrb[4].mxu1 %vm354_vm7, %v2387_v6 }
 0x3fd   :  { %1956 = vmatprep.mubr.msk.bf16.mxu1 %vm2179_vm1, %v2178_v4 }
 0x4cf   :  { %v395_v12 = vpop.f32.mrb[4].mxu1 }
 0x4d0   :  { %v396_v14 = vadd.f32 %v395_v12, %v2401_v10  ;;  %v1952_v15 = vpop.f32.mrb[5].mxu1 }
 0x4d1   :  { %v398_v16 = vpop.f32.mrb[6].mxu1 }
 0x4d2   :  { %v399_v17 = vadd.f32 %v398_v16, %v2403_v13  ;;  %v1953_v19 = vpop.f32.mrb[7].mxu1  ;;  %v402_v18 = vsel %vm354_vm7, %v396_v14, -inf }
 0x4d3   :  { %403 = vmax.xlane.f32.xlu1 %v402_v18 }
 0x4d4   :  { %v405_v11 = vsel %vm354_vm7, %v399_v17, -inf }
 0x4d5   :  { %406 = vmax.xlane.f32.xlu0 %v405_v11 }
 0x4e4   :  { %475 = vrot.lane.b32.xlu1 %v2387_v6, %s2182_s5 }
 0x560   :  { %v404_v20 = vpop.xlane.xlu1 %403 }
 0x561   :  { %v408_v21 = vsub.f32 %v396_v14, %v404_v20  ;;  %v2095_v14 = vld [vmem:[%s2676_s8] sm:$0xff]  }
 0x562   :  { %v407_v22 = vpop.xlane.xlu0 %406 }
 0x563   :  { %v410_v23 = vmul.f32 1.442695, %v408_v21  ;;  %v409_v24 = vsub.f32 %v399_v17, %v407_v22 }
 0x564   :  { %v476_v37 = vpop.permute.xlu1 %475 }
 0x565   :  { %2119 = vpow2.f32 %v410_v23  ;;  %v412_v25 = vmul.f32 1.442695, %v409_v24  ;;  %v481_v39 = vsel %vm354_vm7, %v476_v37, 0 }
 0x567   :  { %2121 = vpow2.f32 %v412_v25  ;;  %v1789_v25 = vld [vmem:[%s2677_s9] ss:$0 sm:$0xff] }
 0x56f   :  { %v2120_v26 = vpop.eup %2119 }
 0x570   :  { %v414_v27 = vsel %vm354_vm7, %v2120_v26, 0.0 }
 0x571   :  { %v2122_v28 = vpop.eup %2121  ;;  %415 = vadd.xlane.f32.xlu0 %v414_v27 }
 0x572   :  { %v417_v29 = vsel %vm354_vm7, %v2122_v28, 0.0 }
 0x575   :  { %418 = vadd.xlane.f32.xlu0 %v417_v29 }
 0x58b   :  { %425 = vrot.lane.b32.xlu0 %v2387_v6, %s2183_s25 }
 0x58f   :  { %473 = vrot.lane.b32.xlu0 %v2387_v6, %s2184_s26 }
 0x5fe   :  { %v416_v30 = vpop.xlane.xlu0 %415 }
 0x5ff   :  { %2123 = vrcp.f32 %v416_v30 }
 0x602   :  { %v419_v31 = vpop.xlane.xlu0 %418 }
 0x603   :  { %2125 = vrcp.f32 %v419_v31 }
 0x606   :  { %v426_v32 = vpop.permute.xlu0 %425 }
 0x607   :  { %1955 = vmatpush3.bf16.msra.mxu1 %v426_v32 }
 0x608   :  { %1960 = vmatprep.subr.bf16.mxu1 %v2178_v4 }
 0x609   :  { %v2124_v33 = vpop.eup %2123 }
 0x60a   :  { %v422_v35 = vmul.f32 %v2124_v33, %v2120_v26  ;;  %v474_v40 = vpop.permute.xlu0 %473 }
 0x60d   :  { %v2126_v34 = vpop.eup %2125 }
 0x60e   :  { %v423_v36 = vmul.f32 %v2126_v34, %v2122_v28 }
 0x610   :  { %v424_v38 = vpack.c.bf16 %v423_v36, %v422_v35 }
 0x612   :  { %1957 = vmatmul.mubr.msk.bf16.vlgmr.msra.gmra.mrb[8].mxu1 %vm354_vm7, %v424_v38 }
 0x613   :  { %1961 = vmatpush3.bf16.xpose.msra.mxu1 %v481_v39  ;;  %1962 = vmatprep.mubr.msk.bf16.mxu1 %vm2179_vm1, %v2178_v4 }
 0x614   :  { %1972 = vmatprep.subr.bf16.mxu1 %v2178_v4 }
 0x61a   :  { %1963 = vmatmul.mubr.msk.bf16.vlgmr.msra.gmra.mrb[12].mxu1 %vm354_vm7, %v474_v40 }
 0x61b   :  { %1974 = vmatprep.mubr.msk.bf16.mxu1 %vm2179_vm1, %v2178_v4 }
 0x6e5   :  { %v465_v41 = vpop.f32.mrb[8].mxu1 }
 0x6e6   :  { %v1958_v42 = vpop.f32.mrb[9].mxu1 }
 0x6e7   :  { %v468_v43 = vpop.f32.mrb[10].mxu1 }
 0x6e8   :  { %v472_v44 = vpack.c.bf16 %v468_v43, %v465_v41  ;;  %v1959_v45 = vpop.f32.mrb[11].mxu1 }
 0x6ed   :  { %v517_v46 = vpop.f32.mrb[12].mxu1 }
 0x6ee   :  { %v518_v47 = vadd.f32 %v517_v46, %v2401_v10  ;;  %v1964_v48 = vpop.f32.mrb[13].mxu1  ;;  %v2098_v46 = vld [vmem:[%s2678_s12 + $0x8] sm:$0xff]  }
 0x6ef   :  { %v520_v49 = vpop.f32.mrb[14].mxu1 }
 0x6f0   :  { %v521_v50 = vadd.f32 %v520_v49, %v2403_v13  ;;  %v1965_v51 = vpop.f32.mrb[15].mxu1  ;;  %v524_v52 = vsel %vm354_vm7, %v518_v47, -inf }
 0x6f1   :  { %525 = vmax.xlane.f32.xlu0 %v524_v52 }
 0x6f2   :  { %v527_v53 = vsel %vm354_vm7, %v521_v50, -inf }
 0x6f3   :  { %528 = vmax.xlane.f32.xlu1 %v527_v53 }
 0x77e   :  { %v526_v54 = vpop.xlane.xlu0 %525 }
 0x77f   :  { %v530_v55 = vsub.f32 %v518_v47, %v526_v54 }
 0x780   :  { %v529_v56 = vpop.xlane.xlu1 %528 }
 0x781   :  { %v532_v57 = vmul.f32 1.442695, %v530_v55  ;;  %v531_v58 = vsub.f32 %v521_v50, %v529_v56  ;;  %v1790_v55 = vld [vmem:[%s2679_s10] ss:$0 sm:$0xff] }
 0x783   :  { %2127 = vpow2.f32 %v532_v57  ;;  %v534_v61 = vmul.f32 1.442695, %v531_v58 }
 0x785   :  { %2129 = vpow2.f32 %v534_v61  ;;  %v1791_v61 = vld [vmem:[%s2680_s11] ss:$0 sm:$0xff] }
 0x78d   :  { %v2128_v62 = vpop.eup %2127 }
 0x78e   :  { %v536_v63 = vsel %vm354_vm7, %v2128_v62, 0.0 }
 0x78f   :  { %v2130_v0 = vpop.eup %2129  ;;  %537 = vadd.xlane.f32.xlu0 %v536_v63 }
 0x790   :  { %v539_v1 = vsel %vm354_vm7, %v2130_v0, 0.0 }
 0x793   :  { %540 = vadd.xlane.f32.xlu0 %v539_v1 }
 0x7a9   :  { %547 = vrot.lane.b32.xlu0 %v2387_v6, %s2185_s27  ;;  %v2096_v6 = vld [vmem:[%s2676_s8 + $0x8] sm:$0xff]  }
 0x7aa   :  { %1973 = vmatpush3.bf16.msra.mxu1 %v2096_v6 }
 0x7ab   :  { %1984 = vmatprep.subr.bf16.mxu1 %v2178_v4 }
 0x81c   :  { %v538_v2 = vpop.xlane.xlu0 %537 }
 0x81d   :  { %2131 = vrcp.f32 %v538_v2  ;;  %v2099_v2 = vld [vmem:[%s2681_s14] sm:$0xff]  }
 0x820   :  { %v541_v3 = vpop.xlane.xlu0 %540 }
 0x821   :  { %2133 = vrcp.f32 %v541_v3  ;;  %v2100_v3 = vld [vmem:[%s2681_s14 + $0x8] sm:$0xff]  }
 0x824   :  { %v548_v5 = vpop.permute.xlu0 %547 }
 0x825   :  { %1967 = vmatpush3.bf16.msra.mxu0 %v548_v5  ;;  %v2101_v5 = vld [vmem:[%s2681_s14 + $0x10] sm:$0xff]  }
 0x826   :  { %1978 = vmatprep.subr.bf16.mxu0 %v2178_v4 }
 0x827   :  { %v2132_v7 = vpop.eup %2131 }
 0x828   :  { %v544_v9 = vmul.f32 %v2132_v7, %v2128_v62  ;;  %v2102_v7 = vld [vmem:[%s2681_s14 + $0x18] sm:$0xff]  }
 0x82b   :  { %v2134_v8 = vpop.eup %2133 }
 0x82c   :  { %v545_v12 = vmul.f32 %v2134_v8, %v2130_v0  ;;  %v1792_v8 = vld [vmem:[%s2682_s13] ss:$0 sm:$0xff] }
 0x82e   :  { %v546_v15 = vpack.c.bf16 %v545_v12, %v544_v9 }
 0x830   :  { %1969 = vmatmul.mubr.msk.bf16.vlgmr.msra.gmra.mrb[4].mxu0 %vm354_vm7, %v546_v15 }
 0x831   :  { %1979 = vmatpush3.bf16.msra.mxu0 %v2095_v14  ;;  %1980 = vmatprep.mubr.msk.bf16.mxu0 %vm2179_vm1, %v2178_v4 }
 0x832   :  { %1992 = vmatprep.subr.bf16.mxu0 %v2178_v4 }
 0x838   :  { %1981 = vmatmul.mubr.msk.bf16.vlgmr.msra.gmra.mrb[8].mxu0 %vm354_vm7, %v472_v44 }
 0x839   :  { %2000 = vmatprep.mubr.msk.bf16.mxu0 %vm2179_vm1, %v2178_v4  ;;  %1993 = vmatpush3.bf16.msra.mxu0 %v2099_v2  ;;  %v1802_v2 = vld [vmem:[%s2684_s16] ss:$0 sm:$0xff] }
 0x83a   :  { %1994 = vmatprep.subr.bf16.mxu0 %v2178_v4 }
 0x83d   :  { %1995 = vmatpush3.bf16.msra.mxu0 %v2100_v3 }
 0x83e   :  { %1996 = vmatprep.subr.bf16.mxu0 %v2178_v4 }
 0x841   :  { %1997 = vmatpush3.bf16.msra.mxu0 %v2101_v5 }
 0x842   :  { %1998 = vmatprep.subr.bf16.mxu0 %v2178_v4 }
 0x845   :  { %1999 = vmatpush3.bf16.msra.mxu0 %v2102_v7 }
 0x846   :  { %2018 = vmatprep.subr.bf16.mxu0 %v2178_v4 }
 0x903   :  { %v587_v16 = vpop.f32.mrb[4].mxu0 }
 0x904   :  { %v1970_v17 = vpop.f32.mrb[5].mxu0 }
 0x905   :  { %v590_v19 = vpop.f32.mrb[6].mxu0 }
 0x906   :  { %v594_v18 = vpack.c.bf16 %v590_v19, %v587_v16  ;;  %v1971_v11 = vpop.f32.mrb[7].mxu0 }
 0x908   :  { %1975 = vmatmul.mubr.msk.bf16.vlgmr.msra.gmra.mrb[16].mxu1 %vm354_vm7, %v594_v18 }
 0x909   :  { %1988 = vmatprep.mubr.msk.bf16.mxu1 %vm2179_vm1, %v2178_v4 }
 0x90b   :  { %v688_v20 = vpop.f32.mrb[8].mxu0 }
 0x90c   :  { %v1982_v21 = vpop.f32.mrb[9].mxu0 }
 0x90d   :  { %v691_v22 = vpop.f32.mrb[10].mxu0 }
 0x90e   :  { %v1983_v23 = vpop.f32.mrb[11].mxu0 }
 0x9db   :  { %v638_v24 = vpop.f32.mrb[16].mxu1 }
 0x9dc   :  { %v689_v26 = vadd.f32 %v688_v20, %v638_v24  ;;  %v1976_v27 = vpop.f32.mrb[17].mxu1 }
 0x9dd   :  { %v641_v28 = vpop.f32.mrb[18].mxu1 }
 0x9de   :  { %v702_v29 = vadd.f32 %v1789_v25, %v689_v26  ;;  %v692_v30 = vadd.f32 %v691_v22, %v641_v28  ;;  %v1977_v31 = vpop.f32.mrb[19].mxu1 }
 0x9e0   :  { %v703_v32 = vadd.f32 %v1789_v25, %v692_v30  ;;  %v704_v33 = vadd.f32 %v702_v29, %v2375_v59 }
 0x9e2   :  { %v708_v34 = vsel %vm195_vm6, %v704_v33, 0.0  ;;  %v705_v35 = vadd.f32 %v703_v32, %v2377_v60  ;;  %v2097_v60 = vld [vmem:[%s2678_s12] sm:$0xff]  }
 0x9e3   :  { %709 = vadd.xlane.f32.xlu1 %v708_v34  ;;  %1985 = vmatpush3.bf16.msra.mxu1 %v2097_v60 }
 0x9e4   :  { %v711_v36 = vsel %vm195_vm6, %v705_v35, 0.0  ;;  %1986 = vmatprep.subr.bf16.mxu1 %v2178_v4 }
 0x9e7   :  { %712 = vadd.xlane.f32.xlu1 %v711_v36  ;;  %1987 = vmatpush3.bf16.msra.mxu1 %v2098_v46 }
 0x9e8   :  { %2004 = vmatprep.subr.bf16.mxu1 %v2178_v4 }
 0xa70   :  { %v710_v37 = vpop.xlane.xlu1 %709 }
 0xa71   :  { %v714_v38 = vmul.f32 0.03125, %v710_v37 }
 0xa73   :  { %v716_v39 = vsub.f32 %v704_v33, %v714_v38 }
 0xa74   :  { %v713_v40 = vpop.xlane.xlu1 %712 }
 0xa75   :  { %v715_v41 = vmul.f32 0.03125, %v713_v40  ;;  %v718_v42 = vmul.f32 %v716_v39, %v716_v39 }
 0xa77   :  { %v717_v43 = vsub.f32 %v705_v35, %v715_v41  ;;  %v720_v44 = vsel %vm195_vm6, %v718_v42, 0.0  ;;  %v1796_v35 = vld [vmem:[%s2683_s15] ss:$0 sm:$0xff] }
 0xa78   :  { %721 = vadd.xlane.f32.xlu1 %v720_v44 }
 0xa79   :  { %v719_v45 = vmul.f32 %v717_v43, %v717_v43 }
 0xa7b   :  { %v723_v59 = vsel %vm195_vm6, %v719_v45, 0.0 }
 0xa7c   :  { %724 = vadd.xlane.f32.xlu1 %v723_v59 }
 0xb05   :  { %v722_v47 = vpop.xlane.xlu1 %721 }
 0xb06   :  { %v726_v48 = vmul.f32 0.03125, %v722_v47 }
 0xb08   :  { %v728_v49 = vadd.f32 1e-12, %v726_v48 }
 0xb09   :  { %v725_v50 = vpop.xlane.xlu1 %724 }
 0xb0a   :  { %2135 = vrsqrt.f32 %v728_v49  ;;  %v727_v51 = vmul.f32 0.03125, %v725_v50 }
 0xb0c   :  { %v729_v52 = vadd.f32 1e-12, %v727_v51 }
 0xb0e   :  { %2137 = vrsqrt.f32 %v729_v52 }
 0xb14   :  { %v2136_v53 = vpop.eup %2135 }
 0xb15   :  { %v732_v54 = vmul.f32 %v2136_v53, %v716_v39 }
 0xb17   :  { %v740_v57 = vmul.f32 %v1790_v55, %v732_v54  ;;  %v2103_v54 = vld [vmem:[%s2705_s2 + $0x10] sm:$0xff]  }
 0xb18   :  { %v2138_v56 = vpop.eup %2137 }
 0xb19   :  { %v733_v58 = vmul.f32 %v2138_v56, %v717_v43  ;;  %v748_v63 = vadd.f32 %v1791_v61, %v740_v57 }
 0xb1b   :  { %v741_v62 = vmul.f32 %v1790_v55, %v733_v58  ;;  %v2104_v55 = vld [vmem:[%s2705_s2 + $0x18] sm:$0xff]  }
 0xb1d   :  { %v749_v0 = vadd.f32 %v1791_v61, %v741_v62 }
 0xb1f   :  { %v750_v1 = vpack.c.bf16 %v749_v0, %v748_v63 }
 0xb21   :  { %1989 = vmatmul.mubr.msk.bf16.vlgmr.msra.gmra.mrb[20].mxu1 %vm195_vm6, %v750_v1 }
 0xb22   :  { %2008 = vmatprep.mubr.msk.bf16.mxu1 %vm2179_vm1, %v2178_v4  ;;  %2005 = vmatpush3.bf16.msra.mxu1 %v2103_v54 }
 0xb23   :  { %2006 = vmatprep.subr.bf16.mxu1 %v2178_v4 }
 0xb26   :  { %2007 = vmatpush3.bf16.msra.mxu1 %v2104_v55 }
 0xb27   :  { %2012 = vmatprep.subr.bf16.mxu1 %v2178_v4 }
 0xbf4   :  { %v811_v9 = vpop.f32.mrb[20].mxu1 }
 0xbf5   :  { %v812_v12 = vadd.f32 %v1792_v8, %v811_v9  ;;  %v1990_v14 = vpop.f32.mrb[21].mxu1 }
 0xbf6   :  { %v814_v15 = vpop.f32.mrb[22].mxu1 }
 0xbf7   :  { %v818_v6 = vmul.f32 %v812_v12, %v812_v12  ;;  %v815_v16 = vadd.f32 %v1792_v8, %v814_v15  ;;  %v1991_v17 = vpop.f32.mrb[23].mxu1  ;;  %v1803_v8 = vld [vmem:[%s2685_s17] ss:$0 sm:$0xff] }
 0xbf9   :  { %v820_v19 = vmul.f32 %v818_v6, %v812_v12  ;;  %v819_v18 = vmul.f32 %v815_v16, %v815_v16  ;;  %v1813_v6 = vld [vmem:[%s2675_s7 + $0x1] ss:$0 sm:$0xff] }
 0xbfb   :  { %v822_v11 = vmul.f32 0.044715, %v820_v19  ;;  %v821_v20 = vmul.f32 %v819_v18, %v815_v16 }
 0xbfd   :  { %v824_v21 = vadd.f32 %v822_v11, %v812_v12  ;;  %v823_v22 = vmul.f32 0.044715, %v821_v20 }
 0xbff   :  { %v826_v23 = vmul.f32 0.7978846, %v824_v21  ;;  %v825_v24 = vadd.f32 %v823_v22, %v815_v16 }
 0xc01   :  { %2139 = vtanh.f32 %v826_v23  ;;  %v827_v25 = vmul.f32 0.7978846, %v825_v24 }
 0xc03   :  { %2141 = vtanh.f32 %v827_v25 }
 0xc0b   :  { %v2140_v26 = vpop.eup %2139 }
 0xc0c   :  { %v830_v27 = vadd.f32 1.0, %v2140_v26 }
 0xc0d   :  { %v2142_v28 = vpop.eup %2141 }
 0xc0e   :  { %v832_v29 = vmul.f32 0.5, %v830_v27  ;;  %v831_v30 = vadd.f32 1.0, %v2142_v28 }
 0xc10   :  { %v833_v31 = vmul.f32 0.5, %v831_v30  ;;  %v834_v32 = vmul.f32 %v832_v29, %v812_v12 }
 0xc12   :  { %v835_v33 = vmul.f32 %v833_v31, %v815_v16 }
 0xc14   :  { %v836_v34 = vpack.c.bf16 %v835_v33, %v834_v32 }
 0xc16   :  { %2001 = vmatmul.mubr.msk.bf16.vlgmr.msra.gmra.mrb[12].mxu0 %vm876_vm15, %v836_v34 }
 0xc17   :  { %2020 = vmatprep.mubr.msk.bf16.mxu0 %vm2179_vm1, %v2178_v4 }
 0xce9   :  { %v914_v36 = vpop.f32.mrb[12].mxu0 }
 0xcea   :  { %v915_v37 = vadd.f32 %v1796_v35, %v914_v36  ;;  %v2002_v38 = vpop.f32.mrb[13].mxu0 }
 0xceb   :  { %v917_v39 = vpop.f32.mrb[14].mxu0 }
 0xcec   :  { %v918_v40 = vadd.f32 %v1796_v35, %v917_v39  ;;  %v2003_v41 = vpop.f32.mrb[15].mxu0  ;;  %v921_v42 = vadd.f32 %v915_v37, %v748_v63 }
 0xcee   :  { %v925_v43 = vsel %vm195_vm6, %v921_v42, 0.0  ;;  %v922_v44 = vadd.f32 %v918_v40, %v749_v0 }
 0xcef   :  { %926 = vadd.xlane.f32.xlu1 %v925_v43 }
 0xcf0   :  { %v928_v45 = vsel %vm195_vm6, %v922_v44, 0.0 }
 0xcf1   :  { %929 = vadd.xlane.f32.xlu0 %v928_v45 }
 0xd7c   :  { %v927_v59 = vpop.xlane.xlu1 %926 }
 0xd7d   :  { %v931_v60 = vmul.f32 0.03125, %v927_v59 }
 0xd7e   :  { %v930_v46 = vpop.xlane.xlu0 %929 }
 0xd7f   :  { %v933_v47 = vsub.f32 %v921_v42, %v931_v60  ;;  %v932_v48 = vmul.f32 0.03125, %v930_v46 }
 0xd81   :  { %v934_v49 = vsub.f32 %v922_v44, %v932_v48  ;;  %v935_v50 = vmul.f32 %v933_v47, %v933_v47 }
 0xd83   :  { %v937_v51 = vsel %vm195_vm6, %v935_v50, 0.0  ;;  %v936_v52 = vmul.f32 %v934_v49, %v934_v49 }
 0xd84   :  { %938 = vadd.xlane.f32.xlu1 %v937_v51 }
 0xd85   :  { %v940_v53 = vsel %vm195_vm6, %v936_v52, 0.0 }
 0xd88   :  { %941 = vadd.xlane.f32.xlu1 %v940_v53 }
 0xe11   :  { %v939_v56 = vpop.xlane.xlu1 %938 }
 0xe12   :  { %v943_v57 = vmul.f32 0.03125, %v939_v56 }
 0xe14   :  { %v945_v58 = vadd.f32 1e-12, %v943_v57 }
 0xe15   :  { %v942_v61 = vpop.xlane.xlu1 %941 }
 0xe16   :  { %2143 = vrsqrt.f32 %v945_v58  ;;  %v944_v62 = vmul.f32 0.03125, %v942_v61 }
 0xe18   :  { %v946_v63 = vadd.f32 1e-12, %v944_v62 }
 0xe1a   :  { %2145 = vrsqrt.f32 %v946_v63 }
 0xe20   :  { %v2144_v0 = vpop.eup %2143 }
 0xe21   :  { %v949_v1 = vmul.f32 %v2144_v0, %v933_v47 }
 0xe23   :  { %v957_v5 = vmul.f32 %v1802_v2, %v949_v1 }
 0xe24   :  { %v2146_v3 = vpop.eup %2145 }
 0xe25   :  { %v950_v7 = vmul.f32 %v2146_v3, %v934_v49  ;;  %v2521_v12 = vadd.f32 %v1803_v8, %v957_v5 }
 0xe27   :  { %v958_v9 = vmul.f32 %v1802_v2, %v950_v7 }
 0xe29   :  { %v2523_v14 = vadd.f32 %v1803_v8, %v958_v9 }
 0xe2b   :  { %v972_v15 = vpack.c.bf16 %v2523_v14, %v2521_v12 }
 0xe2d   :  { %2009 = vmatmul.mubr.msk.bf16.vlgmr.msra.gmra.mrb[24].mxu1 %vm195_vm6, %v972_v15 }
 0xe2e   :  { %2014 = vmatprep.mubr.msk.bf16.mxu1 %vm2179_vm1, %v2178_v4 }
 0xf00   :  { %v1035_v16 = vpop.f32.mrb[24].mxu1 }
 0xf01   :  { %v2010_v17 = vpop.f32.mrb[25].mxu1  ;;  %v1036_v18 = vadd.f32 %v1813_v6, %v1035_v16 }
 0xf02   :  { %v1038_v19 = vpop.f32.mrb[26].mxu1 }
 0xf03   :  { %v1039_v11 = vadd.f32 %v1813_v6, %v1038_v19  ;;  %v2011_v20 = vpop.f32.mrb[27].mxu1 }
 0xf05   :  { %v2533_v21 = vpack.c.bf16 %v1039_v11, %v1036_v18  ;;  %v2105_v18 = vld [vmem:[%s2676_s8 + $0x10] sm:$0xff]   ;;  %v2106_v11 = vld [vmem:[%s2676_s8 + $0x18] sm:$0xff]  }
 0xf07   :  { %1044 = vrot.lane.b32.xlu1 %v2533_v21, %s2180_s24 }
 0xf0b   :  { %1166 = vrot.lane.b32.xlu1 %v2533_v21, %s2182_s5 }
 0xf0f   :  { %1164 = vrot.lane.b32.xlu1 %v2533_v21, %s2184_s26 }
 0xf79   :  { %v1045_v22 = vpop.permute.xlu1 %1044 }
 0xf7a   :  { %v1050_v23 = vsel %vm354_vm7, %v1045_v22, 0 }
 0xf7b   :  { %2013 = vmatpush3.bf16.xpose.msra.mxu1 %v1050_v23 }
 0xf7c   :  { %2024 = vmatprep.subr.bf16.mxu1 %v2178_v4 }
 0xf7d   :  { %v1167_v24 = vpop.permute.xlu1 %1166 }
 0xf7e   :  { %v1172_v25 = vsel %vm354_vm7, %v1167_v24, 0 }
 0xf81   :  { %v1165_v26 = vpop.permute.xlu1 %1164 }
 0xf82   :  { %2015 = vmatmul.mubr.msk.bf16.vlgmr.msra.gmra.mrb[28].mxu1 %vm354_vm7, %v2533_v21 }
 0xf83   :  { %2025 = vmatpush3.bf16.xpose.msra.mxu1 %v1172_v25  ;;  %2026 = vmatprep.mubr.msk.bf16.mxu1 %vm2179_vm1, %v2178_v4 }
 0xf84   :  { %2036 = vmatprep.subr.bf16.mxu1 %v2178_v4 }
 0xf8a   :  { %2027 = vmatmul.mubr.msk.bf16.vlgmr.msra.gmra.mrb[32].mxu1 %vm354_vm7, %v1165_v26 }
 0xf8b   :  { %2038 = vmatprep.mubr.msk.bf16.mxu1 %vm2179_vm1, %v2178_v4  ;;  %2037 = vmatpush3.bf16.msra.mxu1 %v2106_v11 }
 0xf8c   :  { %2048 = vmatprep.subr.bf16.mxu1 %v2178_v4 }
0x1055   :  { %v1086_v27 = vpop.f32.mrb[28].mxu1 }
0x1056   :  { %v1087_v28 = vadd.f32 %v1086_v27, %v2401_v10  ;;  %v2016_v29 = vpop.f32.mrb[29].mxu1 }
0x1057   :  { %v1089_v30 = vpop.f32.mrb[30].mxu1 }
0x1058   :  { %v1090_v31 = vadd.f32 %v1089_v30, %v2403_v13  ;;  %v2017_v32 = vpop.f32.mrb[31].mxu1  ;;  %v1093_v33 = vsel %vm354_vm7, %v1087_v28, -inf }
0x1059   :  { %1094 = vmax.xlane.f32.xlu0 %v1093_v33 }
0x105a   :  { %v1096_v34 = vsel %vm354_vm7, %v1090_v31, -inf }
0x105b   :  { %1097 = vmax.xlane.f32.xlu1 %v1096_v34 }
0x105d   :  { %v1208_v35 = vpop.f32.mrb[32].mxu1 }
0x105e   :  { %v1209_v36 = vadd.f32 %v1208_v35, %v2401_v10  ;;  %v2028_v37 = vpop.f32.mrb[33].mxu1  ;;  %v1826_v35 = vld [vmem:[%s2677_s9 + $0x1] ss:$0 sm:$0xff] }
0x105f   :  { %v1211_v38 = vpop.f32.mrb[34].mxu1 }
0x1060   :  { %v1212_v39 = vadd.f32 %v1211_v38, %v2403_v13  ;;  %v2029_v40 = vpop.f32.mrb[35].mxu1  ;;  %v1215_v41 = vsel %vm354_vm7, %v1209_v36, -inf }
0x1061   :  { %1216 = vmax.xlane.f32.xlu0 %v1215_v41 }
0x1062   :  { %v1218_v42 = vsel %vm354_vm7, %v1212_v39, -inf }
0x1065   :  { %1219 = vmax.xlane.f32.xlu0 %v1218_v42 }
0x106c   :  { %1238 = vrot.lane.b32.xlu1 %v2533_v21, %s2185_s27 }
0x10e6   :  { %v1095_v43 = vpop.xlane.xlu0 %1094 }
0x10e7   :  { %v1099_v44 = vsub.f32 %v1087_v28, %v1095_v43 }
0x10e8   :  { %v1098_v45 = vpop.xlane.xlu1 %1097 }
0x10e9   :  { %v1101_v59 = vmul.f32 1.442695, %v1099_v44  ;;  %v1100_v60 = vsub.f32 %v1090_v31, %v1098_v45 }
0x10eb   :  { %2147 = vpow2.f32 %v1101_v59  ;;  %v1103_v10 = vmul.f32 1.442695, %v1100_v60 }
0x10ec   :  { %v1239_v9 = vpop.permute.xlu1 %1238 }
0x10ed   :  { %2149 = vpow2.f32 %v1103_v10 }
0x10ee   :  { %v1217_v46 = vpop.xlane.xlu0 %1216 }
0x10ef   :  { %v1221_v13 = vsub.f32 %v1209_v36, %v1217_v46 }
0x10f1   :  { %v1223_v47 = vmul.f32 1.442695, %v1221_v13 }
0x10f2   :  { %v1220_v48 = vpop.xlane.xlu0 %1219 }
0x10f3   :  { %2151 = vpow2.f32 %v1223_v47  ;;  %v1222_v49 = vsub.f32 %v1212_v39, %v1220_v48 }
0x10f5   :  { %v2148_v50 = vpop.eup %2147  ;;  %v1225_v51 = vmul.f32 1.442695, %v1222_v49 }
0x10f6   :  { %v1105_v52 = vsel %vm354_vm7, %v2148_v50, 0.0 }
0x10f7   :  { %v2150_v53 = vpop.eup %2149  ;;  %2153 = vpow2.f32 %v1225_v51  ;;  %1106 = vadd.xlane.f32.xlu0 %v1105_v52  ;;  %v2108_v52 = vld [vmem:[%s2678_s12 + $0x18] sm:$0xff]  }
0x10f8   :  { %v1108_v54 = vsel %vm354_vm7, %v2150_v53, 0.0 }
0x10fb   :  { %1109 = vadd.xlane.f32.xlu0 %v1108_v54 }
0x10fd   :  { %v2152_v55 = vpop.eup %2151 }
0x10fe   :  { %v1227_v56 = vsel %vm354_vm7, %v2152_v55, 0.0 }
0x10ff   :  { %1228 = vadd.xlane.f32.xlu0 %v1227_v56 }
0x1101   :  { %v2154_v57 = vpop.eup %2153 }
0x1102   :  { %v1230_v58 = vsel %vm354_vm7, %v2154_v57, 0.0 }
0x1103   :  { %1231 = vadd.xlane.f32.xlu0 %v1230_v58 }
0x1119   :  { %1116 = vrot.lane.b32.xlu0 %v2533_v21, %s2183_s25 }
0x1184   :  { %v1107_v61 = vpop.xlane.xlu0 %1106 }
0x1185   :  { %2155 = vrcp.f32 %v1107_v61 }
0x1188   :  { %v1110_v62 = vpop.xlane.xlu0 %1109 }
0x1189   :  { %2157 = vrcp.f32 %v1110_v62 }
0x118c   :  { %v1229_v63 = vpop.xlane.xlu0 %1228 }
0x118d   :  { %2159 = vrcp.f32 %v1229_v63  ;;  %v1829_v63 = vld [vmem:[%s2679_s10 + $0x1] ss:$0 sm:$0xff] }
0x118f   :  { %v2156_v1 = vpop.eup %2155 }
0x1190   :  { %v1232_v0 = vpop.xlane.xlu0 %1231  ;;  %v1113_v3 = vmul.f32 %v2156_v1, %v2148_v50 }
0x1191   :  { %2161 = vrcp.f32 %v1232_v0 }
0x1193   :  { %v2158_v2 = vpop.eup %2157 }
0x1194   :  { %v1114_v5 = vmul.f32 %v2158_v2, %v2150_v53  ;;  %v1117_v7 = vpop.permute.xlu0 %1116 }
0x1195   :  { %2019 = vmatpush3.bf16.msra.mxu0 %v1117_v7 }
0x1196   :  { %v1115_v8 = vpack.c.bf16 %v1114_v5, %v1113_v3  ;;  %2030 = vmatprep.subr.bf16.mxu0 %v2178_v4  ;;  %v1830_v3 = vld [vmem:[%s2680_s11 + $0x1] ss:$0 sm:$0xff] }
0x1197   :  { %v2160_v15 = vpop.eup %2159 }
0x1198   :  { %2021 = vmatmul.mubr.msk.bf16.vlgmr.msra.gmra.mrb[16].mxu0 %vm354_vm7, %v1115_v8  ;;  %v1235_v16 = vmul.f32 %v2160_v15, %v2152_v55  ;;  %v2109_v15 = vld [vmem:[%s2681_s14 + $0x20] sm:$0xff]  }
0x1199   :  { %2031 = vmatpush3.bf16.msra.mxu0 %v1239_v9  ;;  %2032 = vmatprep.mubr.msk.bf16.mxu0 %vm2179_vm1, %v2178_v4 }
0x119a   :  { %2042 = vmatprep.subr.bf16.mxu0 %v2178_v4 }
0x119b   :  { %v2162_v6 = vpop.eup %2161 }
0x119c   :  { %v1236_v17 = vmul.f32 %v2162_v6, %v2154_v57  ;;  %v2110_v6 = vld [vmem:[%s2681_s14 + $0x28] sm:$0xff]  }
0x119e   :  { %v1237_v19 = vpack.c.bf16 %v1236_v17, %v1235_v16  ;;  %v2111_v16 = vld [vmem:[%s2681_s14 + $0x30] sm:$0xff]   ;;  %v2112_v17 = vld [vmem:[%s2681_s14 + $0x38] sm:$0xff]  }
0x11a0   :  { %2033 = vmatmul.mubr.msk.bf16.vlgmr.msra.gmra.mrb[20].mxu0 %vm354_vm7, %v1237_v19  ;;  %v1836_v19 = vld [vmem:[%s2682_s13 + $0x1] ss:$0 sm:$0xff] }
0x11a1   :  { %2044 = vmatprep.mubr.msk.bf16.mxu0 %vm2179_vm1, %v2178_v4  ;;  %2043 = vmatpush3.bf16.msra.mxu0 %v2105_v18 }
0x11a2   :  { %2056 = vmatprep.subr.bf16.mxu0 %v2178_v4 }
0x126b   :  { %v1156_v20 = vpop.f32.mrb[16].mxu0 }
0x126c   :  { %v2022_v21 = vpop.f32.mrb[17].mxu0 }
0x126d   :  { %v1159_v22 = vpop.f32.mrb[18].mxu0 }
0x126e   :  { %v1163_v23 = vpack.c.bf16 %v1159_v22, %v1156_v20  ;;  %v2023_v24 = vpop.f32.mrb[19].mxu0 }
0x1270   :  { %2045 = vmatmul.mubr.msk.bf16.vlgmr.msra.gmra.mrb[24].mxu0 %vm354_vm7, %v1163_v23 }
0x1271   :  { %2064 = vmatprep.mubr.msk.bf16.mxu0 %vm2179_vm1, %v2178_v4  ;;  %2057 = vmatpush3.bf16.msra.mxu0 %v2109_v15 }
0x1272   :  { %2058 = vmatprep.subr.bf16.mxu0 %v2178_v4 }
0x1273   :  { %v1278_v25 = vpop.f32.mrb[20].mxu0 }
0x1274   :  { %v2034_v26 = vpop.f32.mrb[21].mxu0 }
0x1275   :  { %v1281_v27 = vpop.f32.mrb[22].mxu0  ;;  %2059 = vmatpush3.bf16.msra.mxu0 %v2110_v6 }
0x1276   :  { %v1285_v28 = vpack.c.bf16 %v1281_v27, %v1278_v25  ;;  %v2035_v29 = vpop.f32.mrb[23].mxu0  ;;  %2060 = vmatprep.subr.bf16.mxu0 %v2178_v4 }
0x1278   :  { %2039 = vmatmul.mubr.msk.bf16.vlgmr.msra.gmra.mrb[36].mxu1 %vm354_vm7, %v1285_v28 }
0x1279   :  { %2052 = vmatprep.mubr.msk.bf16.mxu1 %vm2179_vm1, %v2178_v4  ;;  %2061 = vmatpush3.bf16.msra.mxu0 %v2111_v16 }
0x127a   :  { %2062 = vmatprep.subr.bf16.mxu0 %v2178_v4 }
0x127d   :  { %2063 = vmatpush3.bf16.msra.mxu0 %v2112_v17 }
0x1343   :  { %v1379_v30 = vpop.f32.mrb[24].mxu0 }
0x1344   :  { %v2046_v31 = vpop.f32.mrb[25].mxu0 }
0x1345   :  { %v1382_v32 = vpop.f32.mrb[26].mxu0 }
0x1346   :  { %v2047_v33 = vpop.f32.mrb[27].mxu0 }
0x134b   :  { %v1329_v34 = vpop.f32.mrb[36].mxu1 }
0x134c   :  { %v1380_v36 = vadd.f32 %v1379_v30, %v1329_v34  ;;  %v2040_v37 = vpop.f32.mrb[37].mxu1 }
0x134d   :  { %v1332_v38 = vpop.f32.mrb[38].mxu1 }
0x134e   :  { %v1394_v39 = vadd.f32 %v1826_v35, %v1380_v36  ;;  %v1383_v40 = vadd.f32 %v1382_v32, %v1332_v38  ;;  %v2041_v41 = vpop.f32.mrb[39].mxu1 }
0x1350   :  { %v1395_v42 = vadd.f32 %v1826_v35, %v1383_v40  ;;  %v1396_v43 = vadd.f32 %v1394_v39, %v2521_v12 }
0x1352   :  { %v1402_v44 = vsel %vm195_vm6, %v1396_v43, 0.0  ;;  %v1397_v45 = vadd.f32 %v1395_v42, %v2523_v14  ;;  %v2107_v14 = vld [vmem:[%s2678_s12 + $0x10] sm:$0xff]  }
0x1353   :  { %1403 = vadd.xlane.f32.xlu0 %v1402_v44  ;;  %2049 = vmatpush3.bf16.msra.mxu1 %v2107_v14 }
0x1354   :  { %v1405_v59 = vsel %vm195_vm6, %v1397_v45, 0.0  ;;  %2050 = vmatprep.subr.bf16.mxu1 %v2178_v4 }
0x1355   :  { %1406 = vadd.xlane.f32.xlu1 %v1405_v59 }
0x1357   :  { %2051 = vmatpush3.bf16.msra.mxu1 %v2108_v52 }
0x1358   :  { %2068 = vmatprep.subr.bf16.mxu1 %v2178_v4 }
0x13e0   :  { %v1404_v60 = vpop.xlane.xlu0 %1403 }
0x13e1   :  { %v1408_v10 = vmul.f32 0.03125, %v1404_v60 }
0x13e2   :  { %v1407_v46 = vpop.xlane.xlu1 %1406 }
0x13e3   :  { %v1410_v13 = vsub.f32 %v1396_v43, %v1408_v10  ;;  %v1409_v47 = vmul.f32 0.03125, %v1407_v46  ;;  %v1849_v43 = vld [vmem:[%s2683_s15 + $0x1] ss:$0 sm:$0xff] }
0x13e5   :  { %v1411_v48 = vsub.f32 %v1397_v45, %v1409_v47  ;;  %v1412_v49 = vmul.f32 %v1410_v13, %v1410_v13 }
0x13e7   :  { %v1414_v50 = vsel %vm195_vm6, %v1412_v49, 0.0  ;;  %v1413_v51 = vmul.f32 %v1411_v48, %v1411_v48 }
0x13e8   :  { %1415 = vadd.xlane.f32.xlu0 %v1414_v50 }
0x13e9   :  { %v1417_v12 = vsel %vm195_vm6, %v1413_v51, 0.0 }
0x13ec   :  { %1418 = vadd.xlane.f32.xlu0 %v1417_v12 }
0x1475   :  { %v1416_v53 = vpop.xlane.xlu0 %1415 }
0x1476   :  { %v1420_v54 = vmul.f32 0.03125, %v1416_v53 }
0x1478   :  { %v1422_v55 = vadd.f32 1e-12, %v1420_v54 }
0x1479   :  { %v1419_v56 = vpop.xlane.xlu0 %1418 }
0x147a   :  { %2163 = vrsqrt.f32 %v1422_v55  ;;  %v1421_v57 = vmul.f32 0.03125, %v1419_v56 }
0x147c   :  { %v1423_v58 = vadd.f32 1e-12, %v1421_v57 }
0x147e   :  { %2165 = vrsqrt.f32 %v1423_v58  ;;  %v2113_v58 = vld [vmem:[%s2686_s18] sm:$0xff]  }
0x1484   :  { %v2164_v61 = vpop.eup %2163 }
0x1485   :  { %v1426_v62 = vmul.f32 %v2164_v61, %v1410_v13  ;;  %v2114_v61 = vld [vmem:[%s2686_s18 + $0x8] sm:$0xff]  }
0x1487   :  { %v1434_v1 = vmul.f32 %v1829_v63, %v1426_v62 }
0x1488   :  { %v2166_v0 = vpop.eup %2165 }
0x1489   :  { %v1427_v2 = vmul.f32 %v2166_v0, %v1411_v48  ;;  %v1442_v7 = vadd.f32 %v1830_v3, %v1434_v1 }
0x148b   :  { %v1435_v5 = vmul.f32 %v1829_v63, %v1427_v2 }
0x148d   :  { %v1443_v8 = vadd.f32 %v1830_v3, %v1435_v5 }
0x148f   :  { %v1444_v9 = vpack.c.bf16 %v1443_v8, %v1442_v7 }
0x1491   :  { %2053 = vmatmul.mubr.msk.bf16.vlgmr.msra.gmra.mrb[40].mxu1 %vm195_vm6, %v1444_v9  ;;  %v1857_v9 = vld [vmem:[%s2684_s16 + $0x1] ss:$0 sm:$0xff] }
0x1492   :  { %2072 = vmatprep.mubr.msk.bf16.mxu1 %vm2179_vm1, %v2178_v4  ;;  %2069 = vmatpush3.bf16.msra.mxu1 %v2113_v58  ;;  %vm1747_vm1 = vcmask 254976  }
0x1493   :  { %2070 = vmatprep.subr.bf16.mxu1 %v2178_v4  ;;  %v1858_v4 = vld [vmem:[%s2685_s17 + $0x1] ss:$0 sm:$0xff] }
0x1496   :  { %2071 = vmatpush3.bf16.msra.mxu1 %v2114_v61 }
0x1564   :  { %v1507_v18 = vpop.f32.mrb[40].mxu1 }
0x1565   :  { %v1508_v11 = vadd.f32 %v1836_v19, %v1507_v18  ;;  %v2054_v20 = vpop.f32.mrb[41].mxu1 }
0x1566   :  { %v1510_v21 = vpop.f32.mrb[42].mxu1 }
0x1567   :  { %v1514_v22 = vmul.f32 %v1508_v11, %v1508_v11  ;;  %v1511_v23 = vadd.f32 %v1836_v19, %v1510_v21  ;;  %v2055_v24 = vpop.f32.mrb[43].mxu1  ;;  %v27_v21 = vstv %s2687_s21 }
0x1568   :  { %28 = vst [vmem:[#allocation2] sm:$0x1] %v27_v21 }
0x1569   :  { %v1516_v25 = vmul.f32 %v1514_v22, %v1508_v11  ;;  %v1515_v26 = vmul.f32 %v1511_v23, %v1511_v23  ;;  %v1859_v22 = vld [vmem:[%s2688_s19] ss:$0 sm:$0xff] }
0x156b   :  { %v1518_v27 = vmul.f32 0.044715, %v1516_v25  ;;  %v1517_v28 = vmul.f32 %v1515_v26, %v1511_v23 }
0x156d   :  { %v1520_v29 = vadd.f32 %v1518_v27, %v1508_v11  ;;  %v1519_v30 = vmul.f32 0.044715, %v1517_v28  ;;  %v1863_v28 = vld [vmem:[%s2689_s20] ss:$0 sm:$0xff] }
0x156f   :  { %v1522_v31 = vmul.f32 0.7978846, %v1520_v29  ;;  %v1521_v32 = vadd.f32 %v1519_v30, %v1511_v23 }
0x1571   :  { %2167 = vtanh.f32 %v1522_v31  ;;  %v1523_v33 = vmul.f32 0.7978846, %v1521_v32  ;;  %v1864_v32 = vld [vmem:[#allocation2] ss:$0 sm:$0xff] }
0x1573   :  { %2169 = vtanh.f32 %v1523_v33 }
0x157b   :  { %v2168_v34 = vpop.eup %2167 }
0x157c   :  { %v1526_v35 = vadd.f32 1.0, %v2168_v34 }
0x157d   :  { %v2170_v36 = vpop.eup %2169 }
0x157e   :  { %v1528_v37 = vmul.f32 0.5, %v1526_v35  ;;  %v1527_v38 = vadd.f32 1.0, %v2170_v36 }
0x1580   :  { %v1529_v39 = vmul.f32 0.5, %v1527_v38  ;;  %v1530_v40 = vmul.f32 %v1528_v37, %v1508_v11 }
0x1582   :  { %v1531_v41 = vmul.f32 %v1529_v39, %v1511_v23 }
0x1584   :  { %v1532_v42 = vpack.c.bf16 %v1531_v41, %v1530_v40 }
0x1586   :  { %2065 = vmatmul.mubr.msk.bf16.vlgmr.msra.gmra.mrb[28].mxu0 %vm876_vm15, %v1532_v42 }
0x1659   :  { %v1611_v44 = vpop.f32.mrb[28].mxu0 }
0x165a   :  { %v1612_v45 = vadd.f32 %v1849_v43, %v1611_v44  ;;  %v2066_v59 = vpop.f32.mrb[29].mxu0 }
0x165b   :  { %v1614_v60 = vpop.f32.mrb[30].mxu0 }
0x165c   :  { %v1615_v10 = vadd.f32 %v1849_v43, %v1614_v60  ;;  %v2067_v46 = vpop.f32.mrb[31].mxu0  ;;  %v1618_v13 = vadd.f32 %v1612_v45, %v1442_v7 }
0x165e   :  { %v1624_v47 = vsel %vm195_vm6, %v1618_v13, 0.0  ;;  %v1619_v48 = vadd.f32 %v1615_v10, %v1443_v8 }
0x165f   :  { %1625 = vadd.xlane.f32.xlu1 %v1624_v47 }
0x1660   :  { %v1627_v49 = vsel %vm195_vm6, %v1619_v48, 0.0 }
0x1661   :  { %1628 = vadd.xlane.f32.xlu0 %v1627_v49 }
0x16ec   :  { %v1626_v50 = vpop.xlane.xlu1 %1625 }
0x16ed   :  { %v1630_v51 = vmul.f32 0.03125, %v1626_v50 }
0x16ee   :  { %v1629_v12 = vpop.xlane.xlu0 %1628 }
0x16ef   :  { %v1632_v14 = vsub.f32 %v1618_v13, %v1630_v51  ;;  %v1631_v52 = vmul.f32 0.03125, %v1629_v12 }
0x16f1   :  { %v1633_v53 = vsub.f32 %v1619_v48, %v1631_v52  ;;  %v1634_v54 = vmul.f32 %v1632_v14, %v1632_v14 }
0x16f3   :  { %v1636_v55 = vsel %vm195_vm6, %v1634_v54, 0.0  ;;  %v1635_v56 = vmul.f32 %v1633_v53, %v1633_v53 }
0x16f4   :  { %1637 = vadd.xlane.f32.xlu1 %v1636_v55 }
0x16f5   :  { %v1639_v57 = vsel %vm195_vm6, %v1635_v56, 0.0 }
0x16f6   :  { %1640 = vadd.xlane.f32.xlu0 %v1639_v57 }
0x1781   :  { %v1638_v62 = vpop.xlane.xlu1 %1637 }
0x1782   :  { %v1642_v63 = vmul.f32 0.03125, %v1638_v62 }
0x1783   :  { %v1641_v0 = vpop.xlane.xlu0 %1640 }
0x1784   :  { %v1644_v1 = vadd.f32 1e-12, %v1642_v63  ;;  %v1643_v2 = vmul.f32 0.03125, %v1641_v0 }
0x1786   :  { %2171 = vrsqrt.f32 %v1644_v1  ;;  %v1645_v3 = vadd.f32 1e-12, %v1643_v2 }
0x1788   :  { %2173 = vrsqrt.f32 %v1645_v3 }
0x1790   :  { %v2172_v5 = vpop.eup %2171 }
0x1791   :  { %v1648_v7 = vmul.f32 %v2172_v5, %v1632_v14 }
0x1792   :  { %v2174_v8 = vpop.eup %2173 }
0x1793   :  { %v1649_v15 = vmul.f32 %v2174_v8, %v1633_v53  ;;  %v1656_v6 = vmul.f32 %v1857_v9, %v1648_v7 }
0x1795   :  { %v1657_v16 = vmul.f32 %v1857_v9, %v1649_v15  ;;  %v1664_v19 = vadd.f32 %v1858_v4, %v1656_v6 }
0x1797   :  { %v1665_v17 = vadd.f32 %v1858_v4, %v1657_v16 }
0x1799   :  { %v1667_v18 = vrot.slane %v1665_v17, 7 }
0x179b   :  { %v1670_v11 = vsel %vm1669_vm0, %v1664_v19, %v1667_v18 }
0x179c   :  { %v1671_v20 = vpack.c.bf16 %v1670_v11, %v1670_v11 }
0x179e   :  { %2073 = vmatmul.mubr.msk.bf16.vlgmr.msra.gmra.mrb[44].mxu1 %vm195_vm6, %v1671_v20 }
0x1871   :  { %v1732_v23 = vpop.f32.mrb[44].mxu1 }
0x1872   :  { %v1733_v24 = vadd.f32 %v1859_v22, %v1732_v23  ;;  %v2074_v25 = vpop.f32.mrb[45].mxu1 }
0x1873   :  { %v1735_v26 = vpop.f32.mrb[46].mxu1 }
0x1874   :  { %2175 = vtanh.f32 %v1733_v24  ;;  %v2075_v27 = vpop.f32.mrb[47].mxu1 }
0x187e   :  { %v2176_v29 = vpop.eup %2175 }
0x187f   :  { %v1746_v30 = vmul.f32 %v2176_v29, %v1863_v28 }
0x1881   :  { %v1748_v31 = vsel %vm1747_vm1, %v1746_v30, 0.0 }
0x1882   :  { %1749 = vadd.xlane.f32.xlu0 %v1748_v31 }
0x190f   :  { %v1750_v33 = vpop.xlane.xlu0 %1749 }
0x1910   :  { %v1758_v34 = vadd.f32 %v1864_v32, %v1750_v33 }
0x1912   :  { %1760 = vst.msk [vmem:[%s2690_s22] sm:$0x3] %vm1759_vm2, %v1758_v34 }

</bundles_post_ra>
